<compile_context>
chip_gen: v7x
topology: tpu7x:2x2x1
jax: 0.10.0
libtpu: 0.0.40
codegen_flags: <defaults>
</compile_context>

<pallas_src>
import math

import jax
import jax.numpy as jnp
from jax.experimental import pallas as pl
from jax.experimental.pallas import tpu as pltpu

# ----------------------------- small BERT config -----------------------------
B, S = 2, 8          # batch, sequence length
H = 32               # hidden_size (embedding_dim in BERTA)
NH = 2               # attention heads
HD = H // NH         # head dim
I = 64               # intermediate (FFN) size
L = 2                # encoder layers
VOCAB = 30
TYPE_VOCAB = 2
V2 = VOCAB + TYPE_VOCAB      # stacked embedding-table rows
MAX_POS = 16
O = 4                # output_dim of BERTA.out
OPAD = 128           # lane-dense padded output width (real logits live in [:, :O])
OSUB = 8             # sublane-padded output rows per batch step (unmasked store)
LN_EPS = 1e-12       # BERT LayerNorm eps

_PARAM_NAMES = [
    "emb_table", "pos_emb", "ln_e_g", "ln_e_b",
    "wqkv", "bqkv", "wo", "bo", "ln1_g", "ln1_b",
    "w1", "b1", "w2", "b2", "ln2_g", "ln2_b",
    "wp", "bp", "wout", "bout",
]


def _layernorm(x, g, b):
    mu = jnp.mean(x, axis=-1, keepdims=True)
    var = jnp.mean(jnp.square(x - mu), axis=-1, keepdims=True)
    return (x - mu) * jax.lax.rsqrt(var + LN_EPS) * g + b


def _berta_seq_math(idx, mask_row, p, recip):
    """Forward math for ONE sequence.

    idx:      (S, 2) int32  -- [:, 0] = word id, [:, 1] = token-type id + VOCAB
    mask_row: (1, S) float32 attention mask
    p: name -> Pallas Ref (kernel) or jnp array (reference); every per-layer access is lazy
       (p["wqkv"][l], ...) so the kernel only loads the weights the current layer needs.
    Returns (1, OPAD) f32 padded logits (pooled CLS -> BERTA.out).
    """
    f32, bf16 = jnp.float32, jnp.bfloat16

    # ---- embeddings: single stacked one-hot MXU matmul (word + token-type ids disjoint) ----
    iota = jax.lax.broadcasted_iota(jnp.int32, (S, V2), 1)
    onehot = ((idx[:, 0:1] == iota) | (idx[:, 1:2] == iota)).astype(bf16)      # (S, V2)
    emb = jnp.dot(onehot, p["emb_table"][...], preferred_element_type=f32)      # (S, H)
    emb = emb + p["pos_emb"][...].astype(f32)                                   # broadcast add, no tile
    x = _layernorm(emb, p["ln_e_g"][...], p["ln_e_b"][...])                     # (S, H) f32

    addmask = (1.0 - mask_row) * -10000.0                                       # (1, S) -> (S, S) bcast

    # -------------------------------- encoder layers -----------------------------
    for l in range(L):
        xb = x.astype(bf16)
        # fused QKV projection: one (H, 3H) dot; 1/sqrt(HD)=0.25 already folded into q slice
        qkv = jnp.dot(xb, p["wqkv"][l], preferred_element_type=f32) + p["bqkv"][l]   # (S, 3H)
        qkvb = qkv.astype(bf16)

        ctx_heads = []
        for h in range(NH):
            qh = qkvb[:, h * HD:(h + 1) * HD]                      # (S, HD)
            kh = qkvb[:, H + h * HD:H + (h + 1) * HD]
            vh = qkvb[:, 2 * H + h * HD:2 * H + (h + 1) * HD]
            # NT score dot: contract last dims, no transpose materialized
            sc = jax.lax.dot_general(qh, kh, (((1,), (1,)), ((), ())),
                                     preferred_element_type=f32) + addmask     # (S, S) f32
            m = jnp.max(sc, axis=-1, keepdims=True)
            e = jnp.exp(sc - m)
            prob = (e * recip(jnp.sum(e, axis=-1, keepdims=True))).astype(bf16)
            ctx_heads.append(jnp.dot(prob, vh, preferred_element_type=f32))    # (S, HD)

        # fused output projection: lane-concat heads -> single (H, H) dot (no per-head sums)
        ctx = jnp.concatenate(ctx_heads, axis=-1).astype(bf16)                 # (S, H)
        attn = jnp.dot(ctx, p["wo"][l], preferred_element_type=f32) + p["bo"][l]
        x = _layernorm(x + attn, p["ln1_g"][l], p["ln1_b"][l])

        hid = jnp.dot(x.astype(bf16), p["w1"][l], preferred_element_type=f32) + p["b1"][l]
        # TODO(synk): HF BERT's default "gelu" is erf-based; tanh-approx GELU used here.
        hid = jax.nn.gelu(hid, approximate=True)
        ff = jnp.dot(hid.astype(bf16), p["w2"][l], preferred_element_type=f32) + p["b2"][l]
        x = _layernorm(x + ff, p["ln2_g"][l], p["ln2_b"][l])

    # ------------------- BertPooler ( == bert(...)[1] ) + BERTA.out -------------------
    cls = x[0:1, :]                                                            # (1, H)
    pooled = jnp.tanh(jnp.dot(cls.astype(bf16), p["wp"][...],
                              preferred_element_type=f32) + p["bp"][...])
    logits = jnp.dot(pooled.astype(bf16), p["wout"][...],
                     preferred_element_type=f32) + p["bout"][...]              # (1, OPAD)
    return logits


def berta_kernel(idx_ref, mask_ref, *refs):
    param_refs, out_ref = refs[:-1], refs[-1]
    p = dict(zip(_PARAM_NAMES, param_refs))            # Refs: loaded lazily per layer
    logits = _berta_seq_math(idx_ref[0], mask_ref[0], p,
                             recip=lambda v: pl.reciprocal(v, approx=True))    # (1, OPAD)
    # sublane- and lane-dense store: replicate the single logits row across the padded block
    out_ref[...] = jnp.broadcast_to(logits.reshape(1, 1, OPAD), (1, OSUB, OPAD))


# --------------------------------- params ---------------------------------
def init_params(key):
    """Model-shaped (unfused, f32) parameters."""
    ks = iter(jax.random.split(key, 32))

    def nf(shape, scale=0.02):
        return (scale * jax.random.normal(next(ks), shape)).astype(jnp.float32)

    return {
        "word_emb": nf((VOCAB, H)), "type_emb": nf((TYPE_VOCAB, H)), "pos_emb": nf((MAX_POS, H)),
        "ln_e_g": jnp.ones((1, H), jnp.float32), "ln_e_b": jnp.zeros((1, H), jnp.float32),
        "wq": nf((L, H, H)), "bq": nf((L, 1, H), 0.01),
        "wk": nf((L, H, H)), "bk": nf((L, 1, H), 0.01),
        "wv": nf((L, H, H)), "bv": nf((L, 1, H), 0.01),
        "wo": nf((L, H, H)), "bo": nf((L, 1, H), 0.01),
        "ln1_g": jnp.ones((L, 1, H), jnp.float32), "ln1_b": jnp.zeros((L, 1, H), jnp.float32),
        "w1": nf((L, H, I)), "b1": nf((L, 1, I), 0.01),
        "w2": nf((L, I, H)), "b2": nf((L, 1, H), 0.01),
        "ln2_g": jnp.ones((L, 1, H), jnp.float32), "ln2_b": jnp.zeros((L, 1, H), jnp.float32),
        "wp": nf((H, H)), "bp": nf((1, H), 0.01),
        "wout": nf((H, O)), "bout": nf((1, O), 0.01),
    }


def prepare_kernel_params(mp):
    """Host-side fusion: stacked embedding table, fused QKV (scale folded), padded head."""
    bf16 = jnp.bfloat16
    scale = 1.0 / math.sqrt(HD)                      # 0.25 — exact, folded into the q slice
    wqkv = jnp.concatenate([mp["wq"] * scale, mp["wk"], mp["wv"]], axis=-1)    # (L, H, 3H)
    bqkv = jnp.concatenate([mp["bq"] * scale, mp["bk"], mp["bv"]], axis=-1)    # (L, 1, 3H)
    wout = jnp.zeros((H, OPAD), jnp.float32).at[:, :O].set(mp["wout"])
    bout = jnp.zeros((1, OPAD), jnp.float32).at[:, :O].set(mp["bout"])
    return {
        "emb_table": jnp.concatenate([mp["word_emb"], mp["type_emb"]], axis=0).astype(bf16),
        "pos_emb": mp["pos_emb"][:S].astype(bf16),                             # (S, H)
        "ln_e_g": mp["ln_e_g"], "ln_e_b": mp["ln_e_b"],
        "wqkv": wqkv.astype(bf16), "bqkv": bqkv,
        "wo": mp["wo"].astype(bf16), "bo": mp["bo"],
        "ln1_g": mp["ln1_g"], "ln1_b": mp["ln1_b"],
        "w1": mp["w1"].astype(bf16), "b1": mp["b1"],
        "w2": mp["w2"].astype(bf16), "b2": mp["b2"],
        "ln2_g": mp["ln2_g"], "ln2_b": mp["ln2_b"],
        "wp": mp["wp"].astype(bf16), "bp": mp["bp"],
        "wout": wout.astype(bf16), "bout": bout,
    }


# --------------------------------- wrappers ---------------------------------
def _glue(input_ids, attention_mask, token_type_ids):
    ids = input_ids.astype(jnp.int32)
    tids = token_type_ids.astype(jnp.int32) + VOCAB          # offset into stacked table
    idx = jnp.stack([ids, tids], axis=-1)                    # (B, S, 2)
    mask = attention_mask.astype(jnp.float32).reshape(B, 1, S)
    return idx, mask


def _full_spec(x):
    nd = x.ndim
    return pl.BlockSpec(x.shape, lambda b: (0,) * nd)        # weights: full-extent, resident


@jax.jit
def _berta_forward_impl(kparams, input_ids, attention_mask, token_type_ids):
    idx, mask = _glue(input_ids, attention_mask, token_type_ids)
    inputs = [idx, mask] + [kparams[n] for n in _PARAM_NAMES]
    in_specs = [
        pl.BlockSpec((1, S, 2), lambda b: (b, 0, 0)),
        pl.BlockSpec((1, 1, S), lambda b: (b, 0, 0)),
    ] + [_full_spec(kparams[n]) for n in _PARAM_NAMES]

    padded = pl.pallas_call(
        berta_kernel,
        out_shape=jax.ShapeDtypeStruct((B, OSUB, OPAD), jnp.float32),
        grid=(B,),                                            # one sequence per grid step
        in_specs=in_specs,
        out_specs=pl.BlockSpec((1, OSUB, OPAD), lambda b: (b, 0, 0)),
        compiler_params=pltpu.CompilerParams(
            dimension_semantics=("parallel",)),               # v7x: one sequence per TensorCore
    )(*inputs)
    return padded[:, 0, :O]


def berta_forward(kparams, input_ids, attention_mask, token_type_ids, as_dict=False):
    logits = _berta_forward_impl(kparams, input_ids, attention_mask, token_type_ids)
    return {"logits": logits} if as_dict else logits


def berta_reference(kparams, input_ids, attention_mask, token_type_ids):
    """Pure-JAX reference (same math on the same prepared params, exact softmax reciprocal)."""
    idx, mask = _glue(input_ids, attention_mask, token_type_ids)
    p = {n: kparams[n] for n in _PARAM_NAMES}
    outs = [_berta_seq_math(idx[b], mask[b], p, recip=lambda v: 1.0 / v) for b in range(B)]
    return jnp.concatenate(outs, axis=0)[:, :O]


if __name__ == "__main__":
    key = jax.random.PRNGKey(0)
    pkey, ikey, tkey = jax.random.split(key, 3)
    kparams = prepare_kernel_params(init_params(pkey))

    input_ids = jax.random.randint(ikey, (B, S), 0, VOCAB, dtype=jnp.int32)
    token_type_ids = jax.random.randint(tkey, (B, S), 0, TYPE_VOCAB, dtype=jnp.int32)
    attention_mask = jnp.ones((B, S), jnp.int32).at[:, -2:].set(0)   # pad last 2 tokens

    out = berta_forward(kparams, input_ids, attention_mask, token_type_ids)
    out = jax.block_until_ready(out)

    ref = berta_reference(kparams, input_ids, attention_mask, token_type_ids)
    assert out.shape == (B, O)
    assert jnp.allclose(out, ref, atol=1e-3, rtol=1e-3), (out, ref)

    # dict-output path of the original module
    d = berta_forward(kparams, input_ids, attention_mask, token_type_ids, as_dict=True)
    assert jnp.allclose(d["logits"], out)

    print("KERNEL_OK")
</pallas_src>

<mosaic_0001>
module attributes {stable_mosaic.version = 11 : i64} {
  func.func @berta_kernel(%arg0: i32, %arg1: memref<1x8x2xi32, #tpu.memory_space<vmem>>, %arg2: memref<1x1x8xf32, #tpu.memory_space<vmem>>, %arg3: memref<32x32xbf16, #tpu.memory_space<vmem>>, %arg4: memref<8x32xbf16, #tpu.memory_space<vmem>>, %arg5: memref<1x32xf32, #tpu.memory_space<vmem>>, %arg6: memref<1x32xf32, #tpu.memory_space<vmem>>, %arg7: memref<2x32x96xbf16, #tpu.memory_space<vmem>>, %arg8: memref<2x1x96xf32, #tpu.memory_space<vmem>>, %arg9: memref<2x32x32xbf16, #tpu.memory_space<vmem>>, %arg10: memref<2x1x32xf32, #tpu.memory_space<vmem>>, %arg11: memref<2x1x32xf32, #tpu.memory_space<vmem>>, %arg12: memref<2x1x32xf32, #tpu.memory_space<vmem>>, %arg13: memref<2x32x64xbf16, #tpu.memory_space<vmem>>, %arg14: memref<2x1x64xf32, #tpu.memory_space<vmem>>, %arg15: memref<2x64x32xbf16, #tpu.memory_space<vmem>>, %arg16: memref<2x1x32xf32, #tpu.memory_space<vmem>>, %arg17: memref<2x1x32xf32, #tpu.memory_space<vmem>>, %arg18: memref<2x1x32xf32, #tpu.memory_space<vmem>>, %arg19: memref<32x32xbf16, #tpu.memory_space<vmem>>, %arg20: memref<1x32xf32, #tpu.memory_space<vmem>>, %arg21: memref<32x128xbf16, #tpu.memory_space<vmem>>, %arg22: memref<1x128xf32, #tpu.memory_space<vmem>>, %arg23: memref<1x8x128xf32, #tpu.memory_space<vmem>>) attributes {dimension_semantics = [#tpu.dimension_semantics<parallel>], iteration_bounds = array<i64: 2>, scalar_prefetch = 0 : i64, scratch_operands = 0 : i64, tpu.core_type = #tpu.core_type<tc>, window_params = [{transform_indices = @transform_0, window_bounds = array<i64: 1, 8, 2>}, {transform_indices = @transform_1, window_bounds = array<i64: 1, 1, 8>}, {pipeline_mode = #tpu.pipeline_mode<synchronous>, transform_indices = @transform_2, window_bounds = array<i64: 32, 32>}, {pipeline_mode = #tpu.pipeline_mode<synchronous>, transform_indices = @transform_3, window_bounds = array<i64: 8, 32>}, {pipeline_mode = #tpu.pipeline_mode<synchronous>, transform_indices = @transform_4, window_bounds = array<i64: 1, 32>}, {pipeline_mode = #tpu.pipeline_mode<synchronous>, transform_indices = @transform_5, window_bounds = array<i64: 1, 32>}, {pipeline_mode = #tpu.pipeline_mode<synchronous>, transform_indices = @transform_6, window_bounds = array<i64: 2, 32, 96>}, {pipeline_mode = #tpu.pipeline_mode<synchronous>, transform_indices = @transform_7, window_bounds = array<i64: 2, 1, 96>}, {pipeline_mode = #tpu.pipeline_mode<synchronous>, transform_indices = @transform_8, window_bounds = array<i64: 2, 32, 32>}, {pipeline_mode = #tpu.pipeline_mode<synchronous>, transform_indices = @transform_9, window_bounds = array<i64: 2, 1, 32>}, {pipeline_mode = #tpu.pipeline_mode<synchronous>, transform_indices = @transform_10, window_bounds = array<i64: 2, 1, 32>}, {pipeline_mode = #tpu.pipeline_mode<synchronous>, transform_indices = @transform_11, window_bounds = array<i64: 2, 1, 32>}, {pipeline_mode = #tpu.pipeline_mode<synchronous>, transform_indices = @transform_12, window_bounds = array<i64: 2, 32, 64>}, {pipeline_mode = #tpu.pipeline_mode<synchronous>, transform_indices = @transform_13, window_bounds = array<i64: 2, 1, 64>}, {pipeline_mode = #tpu.pipeline_mode<synchronous>, transform_indices = @transform_14, window_bounds = array<i64: 2, 64, 32>}, {pipeline_mode = #tpu.pipeline_mode<synchronous>, transform_indices = @transform_15, window_bounds = array<i64: 2, 1, 32>}, {pipeline_mode = #tpu.pipeline_mode<synchronous>, transform_indices = @transform_16, window_bounds = array<i64: 2, 1, 32>}, {pipeline_mode = #tpu.pipeline_mode<synchronous>, transform_indices = @transform_17, window_bounds = array<i64: 2, 1, 32>}, {pipeline_mode = #tpu.pipeline_mode<synchronous>, transform_indices = @transform_18, window_bounds = array<i64: 32, 32>}, {pipeline_mode = #tpu.pipeline_mode<synchronous>, transform_indices = @transform_19, window_bounds = array<i64: 1, 32>}, {pipeline_mode = #tpu.pipeline_mode<synchronous>, transform_indices = @transform_20, window_bounds = array<i64: 32, 128>}, {pipeline_mode = #tpu.pipeline_mode<synchronous>, transform_indices = @transform_21, window_bounds = array<i64: 1, 128>}, {transform_indices = @transform_22, window_bounds = array<i64: 1, 8, 128>}]} {
    %c0 = arith.constant 0 : index
    %c0_0 = arith.constant 0 : index
    %c0_1 = arith.constant 0 : index
    %0 = vector.load %arg1[%c0, %c0_0, %c0_1] : memref<1x8x2xi32, #tpu.memory_space<vmem>>, vector<1x8x2xi32>
    %1 = vector.shape_cast %0 : vector<1x8x2xi32> to vector<8x2xi32>
    %c0_2 = arith.constant 0 : index
    %c0_3 = arith.constant 0 : index
    %c0_4 = arith.constant 0 : index
    %2 = vector.load %arg2[%c0_2, %c0_3, %c0_4] : memref<1x1x8xf32, #tpu.memory_space<vmem>>, vector<1x1x8xf32>
    %3 = vector.shape_cast %2 : vector<1x1x8xf32> to vector<1x8xf32>
    %4 = tpu.iota {dimensions = array<i32: 1>} : vector<8x32xi32>
    %5 = vector.extract_strided_slice %1 {offsets = [0, 0], sizes = [8, 1], strides = [1, 1]} : vector<8x2xi32> to vector<8x1xi32>
    %6 = vector.broadcast %5 : vector<8x1xi32> to vector<8x32xi32>
    %7 = arith.cmpi eq, %6, %4 : vector<8x32xi32>
    %8 = vector.extract_strided_slice %1 {offsets = [0, 1], sizes = [8, 1], strides = [1, 1]} : vector<8x2xi32> to vector<8x1xi32>
    %9 = vector.broadcast %8 : vector<8x1xi32> to vector<8x32xi32>
    %10 = arith.cmpi eq, %9, %4 : vector<8x32xi32>
    %11 = arith.ori %7, %10 : vector<8x32xi1>
    %12 = arith.extui %11 : vector<8x32xi1> to vector<8x32xi32>
    %13 = arith.sitofp %12 : vector<8x32xi32> to vector<8x32xf32>
    %14 = arith.truncf %13 : vector<8x32xf32> to vector<8x32xbf16>
    %c0_5 = arith.constant 0 : index
    %c0_6 = arith.constant 0 : index
    %15 = vector.load %arg3[%c0_5, %c0_6] : memref<32x32xbf16, #tpu.memory_space<vmem>>, vector<32x32xbf16>
    %cst = arith.constant dense<0.000000e+00> : vector<8x32xf32>
    %16 = tpu.matmul %14, %15, %cst {dimension_numbers = #tpu.dot_dimension_numbers<[1], [0], [0], [1], [0, 0, 1, 1], [], []>} : vector<8x32xbf16>, vector<32x32xbf16>, vector<8x32xf32> -> vector<8x32xf32>
    %c0_7 = arith.constant 0 : index
    %c0_8 = arith.constant 0 : index
    %17 = vector.load %arg4[%c0_7, %c0_8] : memref<8x32xbf16, #tpu.memory_space<vmem>>, vector<8x32xbf16>
    %18 = arith.extf %17 : vector<8x32xbf16> to vector<8x32xf32>
    %19 = arith.addf %16, %18 : vector<8x32xf32>
    %c0_9 = arith.constant 0 : index
    %c0_10 = arith.constant 0 : index
    %20 = vector.load %arg5[%c0_9, %c0_10] : memref<1x32xf32, #tpu.memory_space<vmem>>, vector<1x32xf32>
    %c0_11 = arith.constant 0 : index
    %c0_12 = arith.constant 0 : index
    %21 = vector.load %arg6[%c0_11, %c0_12] : memref<1x32xf32, #tpu.memory_space<vmem>>, vector<1x32xf32>
    %cst_13 = arith.constant dense<0.000000e+00> : vector<8xf32>
    %22 = vector.multi_reduction <add>, %19, %cst_13 [1] : vector<8x32xf32> to vector<8xf32>
    %23 = vector.shape_cast %22 : vector<8xf32> to vector<8x1xf32>
    %cst_14 = arith.constant 3.200000e+01 : f32
    %24 = vector.broadcast %cst_14 : f32 to vector<8x1xf32>
    %25 = arith.divf %23, %24 : vector<8x1xf32>
    %26 = vector.broadcast %25 : vector<8x1xf32> to vector<8x32xf32>
    %27 = arith.subf %19, %26 : vector<8x32xf32>
    %28 = arith.mulf %27, %27 : vector<8x32xf32>
    %cst_15 = arith.constant dense<0.000000e+00> : vector<8xf32>
    %29 = vector.multi_reduction <add>, %28, %cst_15 [1] : vector<8x32xf32> to vector<8xf32>
    %30 = vector.shape_cast %29 : vector<8xf32> to vector<8x1xf32>
    %cst_16 = arith.constant 3.200000e+01 : f32
    %31 = vector.broadcast %cst_16 : f32 to vector<8x1xf32>
    %32 = arith.divf %30, %31 : vector<8x1xf32>
    %33 = vector.broadcast %25 : vector<8x1xf32> to vector<8x32xf32>
    %34 = arith.subf %19, %33 : vector<8x32xf32>
    %cst_17 = arith.constant 9.99999996E-13 : f32
    %35 = vector.broadcast %cst_17 : f32 to vector<8x1xf32>
    %36 = arith.addf %32, %35 : vector<8x1xf32>
    %37 = math.rsqrt %36 : vector<8x1xf32>
    %38 = vector.broadcast %37 : vector<8x1xf32> to vector<8x32xf32>
    %39 = arith.mulf %34, %38 : vector<8x32xf32>
    %40 = vector.broadcast %20 : vector<1x32xf32> to vector<8x32xf32>
    %41 = arith.mulf %39, %40 : vector<8x32xf32>
    %42 = vector.broadcast %21 : vector<1x32xf32> to vector<8x32xf32>
    %43 = arith.addf %41, %42 : vector<8x32xf32>
    %cst_18 = arith.constant 1.000000e+00 : f32
    %44 = vector.broadcast %cst_18 : f32 to vector<1x8xf32>
    %45 = arith.subf %44, %3 : vector<1x8xf32>
    %cst_19 = arith.constant -1.000000e+04 : f32
    %46 = vector.broadcast %cst_19 : f32 to vector<1x8xf32>
    %47 = arith.mulf %45, %46 : vector<1x8xf32>
    %48 = arith.truncf %43 : vector<8x32xf32> to vector<8x32xbf16>
    %c0_20 = arith.constant 0 : index
    %c0_21 = arith.constant 0 : index
    %c0_22 = arith.constant 0 : index
    %49 = vector.load %arg7[%c0_20, %c0_21, %c0_22] : memref<2x32x96xbf16, #tpu.memory_space<vmem>>, vector<1x32x96xbf16>
    %50 = vector.shape_cast %49 : vector<1x32x96xbf16> to vector<32x96xbf16>
    %cst_23 = arith.constant dense<0.000000e+00> : vector<8x96xf32>
    %51 = tpu.matmul %48, %50, %cst_23 {dimension_numbers = #tpu.dot_dimension_numbers<[1], [0], [0], [1], [0, 0, 1, 1], [], []>} : vector<8x32xbf16>, vector<32x96xbf16>, vector<8x96xf32> -> vector<8x96xf32>
    %c0_24 = arith.constant 0 : index
    %c0_25 = arith.constant 0 : index
    %c0_26 = arith.constant 0 : index
    %52 = vector.load %arg8[%c0_24, %c0_25, %c0_26] : memref<2x1x96xf32, #tpu.memory_space<vmem>>, vector<1x1x96xf32>
    %53 = vector.shape_cast %52 : vector<1x1x96xf32> to vector<1x96xf32>
    %54 = vector.broadcast %53 : vector<1x96xf32> to vector<8x96xf32>
    %55 = arith.addf %51, %54 : vector<8x96xf32>
    %56 = arith.truncf %55 : vector<8x96xf32> to vector<8x96xbf16>
    %57 = vector.extract_strided_slice %56 {offsets = [0, 0], sizes = [8, 16], strides = [1, 1]} : vector<8x96xbf16> to vector<8x16xbf16>
    %58 = vector.extract_strided_slice %56 {offsets = [0, 32], sizes = [8, 16], strides = [1, 1]} : vector<8x96xbf16> to vector<8x16xbf16>
    %59 = vector.extract_strided_slice %56 {offsets = [0, 64], sizes = [8, 16], strides = [1, 1]} : vector<8x96xbf16> to vector<8x16xbf16>
    %cst_27 = arith.constant dense<0.000000e+00> : vector<8x8xf32>
    %60 = tpu.matmul %57, %58, %cst_27 {dimension_numbers = #tpu.dot_dimension_numbers<[1], [1], [0], [0], [0, 0, 1, 0], [], []>} : vector<8x16xbf16>, vector<8x16xbf16>, vector<8x8xf32> -> vector<8x8xf32>
    %61 = vector.broadcast %47 : vector<1x8xf32> to vector<8x8xf32>
    %62 = arith.addf %60, %61 : vector<8x8xf32>
    %cst_28 = arith.constant dense<0xFF800000> : vector<8xf32>
    %63 = vector.multi_reduction <maximumf>, %62, %cst_28 [1] : vector<8x8xf32> to vector<8xf32>
    %64 = vector.shape_cast %63 : vector<8xf32> to vector<8x1xf32>
    %65 = vector.broadcast %64 : vector<8x1xf32> to vector<8x8xf32>
    %66 = arith.subf %62, %65 : vector<8x8xf32>
    %67 = math.exp %66 : vector<8x8xf32>
    %cst_29 = arith.constant dense<0.000000e+00> : vector<8xf32>
    %68 = vector.multi_reduction <add>, %67, %cst_29 [1] : vector<8x8xf32> to vector<8xf32>
    %69 = vector.shape_cast %68 : vector<8xf32> to vector<8x1xf32>
    %70 = tpu.reciprocal %69 {approx = true} : vector<8x1xf32> -> vector<8x1xf32>
    %71 = vector.broadcast %70 : vector<8x1xf32> to vector<8x8xf32>
    %72 = arith.mulf %67, %71 : vector<8x8xf32>
    %73 = arith.truncf %72 : vector<8x8xf32> to vector<8x8xbf16>
    %cst_30 = arith.constant dense<0.000000e+00> : vector<8x16xf32>
    %74 = tpu.matmul %73, %59, %cst_30 {dimension_numbers = #tpu.dot_dimension_numbers<[1], [0], [0], [1], [0, 0, 1, 1], [], []>} : vector<8x8xbf16>, vector<8x16xbf16>, vector<8x16xf32> -> vector<8x16xf32>
    %75 = vector.extract_strided_slice %56 {offsets = [0, 16], sizes = [8, 16], strides = [1, 1]} : vector<8x96xbf16> to vector<8x16xbf16>
    %76 = vector.extract_strided_slice %56 {offsets = [0, 48], sizes = [8, 16], strides = [1, 1]} : vector<8x96xbf16> to vector<8x16xbf16>
    %77 = vector.extract_strided_slice %56 {offsets = [0, 80], sizes = [8, 16], strides = [1, 1]} : vector<8x96xbf16> to vector<8x16xbf16>
    %cst_31 = arith.constant dense<0.000000e+00> : vector<8x8xf32>
    %78 = tpu.matmul %75, %76, %cst_31 {dimension_numbers = #tpu.dot_dimension_numbers<[1], [1], [0], [0], [0, 0, 1, 0], [], []>} : vector<8x16xbf16>, vector<8x16xbf16>, vector<8x8xf32> -> vector<8x8xf32>
    %79 = vector.broadcast %47 : vector<1x8xf32> to vector<8x8xf32>
    %80 = arith.addf %78, %79 : vector<8x8xf32>
    %cst_32 = arith.constant dense<0xFF800000> : vector<8xf32>
    %81 = vector.multi_reduction <maximumf>, %80, %cst_32 [1] : vector<8x8xf32> to vector<8xf32>
    %82 = vector.shape_cast %81 : vector<8xf32> to vector<8x1xf32>
    %83 = vector.broadcast %82 : vector<8x1xf32> to vector<8x8xf32>
    %84 = arith.subf %80, %83 : vector<8x8xf32>
    %85 = math.exp %84 : vector<8x8xf32>
    %cst_33 = arith.constant dense<0.000000e+00> : vector<8xf32>
    %86 = vector.multi_reduction <add>, %85, %cst_33 [1] : vector<8x8xf32> to vector<8xf32>
    %87 = vector.shape_cast %86 : vector<8xf32> to vector<8x1xf32>
    %88 = tpu.reciprocal %87 {approx = true} : vector<8x1xf32> -> vector<8x1xf32>
    %89 = vector.broadcast %88 : vector<8x1xf32> to vector<8x8xf32>
    %90 = arith.mulf %85, %89 : vector<8x8xf32>
    %91 = arith.truncf %90 : vector<8x8xf32> to vector<8x8xbf16>
    %cst_34 = arith.constant dense<0.000000e+00> : vector<8x16xf32>
    %92 = tpu.matmul %91, %77, %cst_34 {dimension_numbers = #tpu.dot_dimension_numbers<[1], [0], [0], [1], [0, 0, 1, 1], [], []>} : vector<8x8xbf16>, vector<8x16xbf16>, vector<8x16xf32> -> vector<8x16xf32>
    %93 = tpu.concatenate %74, %92 in 1 : vector<8x16xf32>, vector<8x16xf32> -> vector<8x32xf32>
    %94 = arith.truncf %93 : vector<8x32xf32> to vector<8x32xbf16>
    %c0_35 = arith.constant 0 : index
    %c0_36 = arith.constant 0 : index
    %c0_37 = arith.constant 0 : index
    %95 = vector.load %arg9[%c0_35, %c0_36, %c0_37] : memref<2x32x32xbf16, #tpu.memory_space<vmem>>, vector<1x32x32xbf16>
    %96 = vector.shape_cast %95 : vector<1x32x32xbf16> to vector<32x32xbf16>
    %cst_38 = arith.constant dense<0.000000e+00> : vector<8x32xf32>
    %97 = tpu.matmul %94, %96, %cst_38 {dimension_numbers = #tpu.dot_dimension_numbers<[1], [0], [0], [1], [0, 0, 1, 1], [], []>} : vector<8x32xbf16>, vector<32x32xbf16>, vector<8x32xf32> -> vector<8x32xf32>
    %c0_39 = arith.constant 0 : index
    %c0_40 = arith.constant 0 : index
    %c0_41 = arith.constant 0 : index
    %98 = vector.load %arg10[%c0_39, %c0_40, %c0_41] : memref<2x1x32xf32, #tpu.memory_space<vmem>>, vector<1x1x32xf32>
    %99 = vector.shape_cast %98 : vector<1x1x32xf32> to vector<1x32xf32>
    %100 = vector.broadcast %99 : vector<1x32xf32> to vector<8x32xf32>
    %101 = arith.addf %97, %100 : vector<8x32xf32>
    %102 = arith.addf %43, %101 : vector<8x32xf32>
    %c0_42 = arith.constant 0 : index
    %c0_43 = arith.constant 0 : index
    %c0_44 = arith.constant 0 : index
    %103 = vector.load %arg11[%c0_42, %c0_43, %c0_44] : memref<2x1x32xf32, #tpu.memory_space<vmem>>, vector<1x1x32xf32>
    %104 = vector.shape_cast %103 : vector<1x1x32xf32> to vector<1x32xf32>
    %c0_45 = arith.constant 0 : index
    %c0_46 = arith.constant 0 : index
    %c0_47 = arith.constant 0 : index
    %105 = vector.load %arg12[%c0_45, %c0_46, %c0_47] : memref<2x1x32xf32, #tpu.memory_space<vmem>>, vector<1x1x32xf32>
    %106 = vector.shape_cast %105 : vector<1x1x32xf32> to vector<1x32xf32>
    %cst_48 = arith.constant dense<0.000000e+00> : vector<8xf32>
    %107 = vector.multi_reduction <add>, %102, %cst_48 [1] : vector<8x32xf32> to vector<8xf32>
    %108 = vector.shape_cast %107 : vector<8xf32> to vector<8x1xf32>
    %cst_49 = arith.constant 3.200000e+01 : f32
    %109 = vector.broadcast %cst_49 : f32 to vector<8x1xf32>
    %110 = arith.divf %108, %109 : vector<8x1xf32>
    %111 = vector.broadcast %110 : vector<8x1xf32> to vector<8x32xf32>
    %112 = arith.subf %102, %111 : vector<8x32xf32>
    %113 = arith.mulf %112, %112 : vector<8x32xf32>
    %cst_50 = arith.constant dense<0.000000e+00> : vector<8xf32>
    %114 = vector.multi_reduction <add>, %113, %cst_50 [1] : vector<8x32xf32> to vector<8xf32>
    %115 = vector.shape_cast %114 : vector<8xf32> to vector<8x1xf32>
    %cst_51 = arith.constant 3.200000e+01 : f32
    %116 = vector.broadcast %cst_51 : f32 to vector<8x1xf32>
    %117 = arith.divf %115, %116 : vector<8x1xf32>
    %118 = vector.broadcast %110 : vector<8x1xf32> to vector<8x32xf32>
    %119 = arith.subf %102, %118 : vector<8x32xf32>
    %cst_52 = arith.constant 9.99999996E-13 : f32
    %120 = vector.broadcast %cst_52 : f32 to vector<8x1xf32>
    %121 = arith.addf %117, %120 : vector<8x1xf32>
    %122 = math.rsqrt %121 : vector<8x1xf32>
    %123 = vector.broadcast %122 : vector<8x1xf32> to vector<8x32xf32>
    %124 = arith.mulf %119, %123 : vector<8x32xf32>
    %125 = vector.broadcast %104 : vector<1x32xf32> to vector<8x32xf32>
    %126 = arith.mulf %124, %125 : vector<8x32xf32>
    %127 = vector.broadcast %106 : vector<1x32xf32> to vector<8x32xf32>
    %128 = arith.addf %126, %127 : vector<8x32xf32>
    %129 = arith.truncf %128 : vector<8x32xf32> to vector<8x32xbf16>
    %c0_53 = arith.constant 0 : index
    %c0_54 = arith.constant 0 : index
    %c0_55 = arith.constant 0 : index
    %130 = vector.load %arg13[%c0_53, %c0_54, %c0_55] : memref<2x32x64xbf16, #tpu.memory_space<vmem>>, vector<1x32x64xbf16>
    %131 = vector.shape_cast %130 : vector<1x32x64xbf16> to vector<32x64xbf16>
    %cst_56 = arith.constant dense<0.000000e+00> : vector<8x64xf32>
    %132 = tpu.matmul %129, %131, %cst_56 {dimension_numbers = #tpu.dot_dimension_numbers<[1], [0], [0], [1], [0, 0, 1, 1], [], []>} : vector<8x32xbf16>, vector<32x64xbf16>, vector<8x64xf32> -> vector<8x64xf32>
    %c0_57 = arith.constant 0 : index
    %c0_58 = arith.constant 0 : index
    %c0_59 = arith.constant 0 : index
    %133 = vector.load %arg14[%c0_57, %c0_58, %c0_59] : memref<2x1x64xf32, #tpu.memory_space<vmem>>, vector<1x1x64xf32>
    %134 = vector.shape_cast %133 : vector<1x1x64xf32> to vector<1x64xf32>
    %135 = vector.broadcast %134 : vector<1x64xf32> to vector<8x64xf32>
    %136 = arith.addf %132, %135 : vector<8x64xf32>
    %137 = arith.mulf %136, %136 : vector<8x64xf32>
    %138 = arith.mulf %136, %137 : vector<8x64xf32>
    %cst_60 = arith.constant 4.471500e-02 : f32
    %139 = vector.broadcast %cst_60 : f32 to vector<8x64xf32>
    %140 = arith.mulf %139, %138 : vector<8x64xf32>
    %141 = arith.addf %136, %140 : vector<8x64xf32>
    %cst_61 = arith.constant 0.797884583 : f32
    %142 = vector.broadcast %cst_61 : f32 to vector<8x64xf32>
    %143 = arith.mulf %142, %141 : vector<8x64xf32>
    %144 = math.tanh %143 : vector<8x64xf32>
    %cst_62 = arith.constant 1.000000e+00 : f32
    %145 = vector.broadcast %cst_62 : f32 to vector<8x64xf32>
    %146 = arith.addf %145, %144 : vector<8x64xf32>
    %cst_63 = arith.constant 5.000000e-01 : f32
    %147 = vector.broadcast %cst_63 : f32 to vector<8x64xf32>
    %148 = arith.mulf %147, %146 : vector<8x64xf32>
    %149 = arith.mulf %136, %148 : vector<8x64xf32>
    %150 = arith.truncf %149 : vector<8x64xf32> to vector<8x64xbf16>
    %c0_64 = arith.constant 0 : index
    %c0_65 = arith.constant 0 : index
    %c0_66 = arith.constant 0 : index
    %151 = vector.load %arg15[%c0_64, %c0_65, %c0_66] : memref<2x64x32xbf16, #tpu.memory_space<vmem>>, vector<1x64x32xbf16>
    %152 = vector.shape_cast %151 : vector<1x64x32xbf16> to vector<64x32xbf16>
    %cst_67 = arith.constant dense<0.000000e+00> : vector<8x32xf32>
    %153 = tpu.matmul %150, %152, %cst_67 {dimension_numbers = #tpu.dot_dimension_numbers<[1], [0], [0], [1], [0, 0, 1, 1], [], []>} : vector<8x64xbf16>, vector<64x32xbf16>, vector<8x32xf32> -> vector<8x32xf32>
    %c0_68 = arith.constant 0 : index
    %c0_69 = arith.constant 0 : index
    %c0_70 = arith.constant 0 : index
    %154 = vector.load %arg16[%c0_68, %c0_69, %c0_70] : memref<2x1x32xf32, #tpu.memory_space<vmem>>, vector<1x1x32xf32>
    %155 = vector.shape_cast %154 : vector<1x1x32xf32> to vector<1x32xf32>
    %156 = vector.broadcast %155 : vector<1x32xf32> to vector<8x32xf32>
    %157 = arith.addf %153, %156 : vector<8x32xf32>
    %158 = arith.addf %128, %157 : vector<8x32xf32>
    %c0_71 = arith.constant 0 : index
    %c0_72 = arith.constant 0 : index
    %c0_73 = arith.constant 0 : index
    %159 = vector.load %arg17[%c0_71, %c0_72, %c0_73] : memref<2x1x32xf32, #tpu.memory_space<vmem>>, vector<1x1x32xf32>
    %160 = vector.shape_cast %159 : vector<1x1x32xf32> to vector<1x32xf32>
    %c0_74 = arith.constant 0 : index
    %c0_75 = arith.constant 0 : index
    %c0_76 = arith.constant 0 : index
    %161 = vector.load %arg18[%c0_74, %c0_75, %c0_76] : memref<2x1x32xf32, #tpu.memory_space<vmem>>, vector<1x1x32xf32>
    %162 = vector.shape_cast %161 : vector<1x1x32xf32> to vector<1x32xf32>
    %cst_77 = arith.constant dense<0.000000e+00> : vector<8xf32>
    %163 = vector.multi_reduction <add>, %158, %cst_77 [1] : vector<8x32xf32> to vector<8xf32>
    %164 = vector.shape_cast %163 : vector<8xf32> to vector<8x1xf32>
    %cst_78 = arith.constant 3.200000e+01 : f32
    %165 = vector.broadcast %cst_78 : f32 to vector<8x1xf32>
    %166 = arith.divf %164, %165 : vector<8x1xf32>
    %167 = vector.broadcast %166 : vector<8x1xf32> to vector<8x32xf32>
    %168 = arith.subf %158, %167 : vector<8x32xf32>
    %169 = arith.mulf %168, %168 : vector<8x32xf32>
    %cst_79 = arith.constant dense<0.000000e+00> : vector<8xf32>
    %170 = vector.multi_reduction <add>, %169, %cst_79 [1] : vector<8x32xf32> to vector<8xf32>
    %171 = vector.shape_cast %170 : vector<8xf32> to vector<8x1xf32>
    %cst_80 = arith.constant 3.200000e+01 : f32
    %172 = vector.broadcast %cst_80 : f32 to vector<8x1xf32>
    %173 = arith.divf %171, %172 : vector<8x1xf32>
    %174 = vector.broadcast %166 : vector<8x1xf32> to vector<8x32xf32>
    %175 = arith.subf %158, %174 : vector<8x32xf32>
    %cst_81 = arith.constant 9.99999996E-13 : f32
    %176 = vector.broadcast %cst_81 : f32 to vector<8x1xf32>
    %177 = arith.addf %173, %176 : vector<8x1xf32>
    %178 = math.rsqrt %177 : vector<8x1xf32>
    %179 = vector.broadcast %178 : vector<8x1xf32> to vector<8x32xf32>
    %180 = arith.mulf %175, %179 : vector<8x32xf32>
    %181 = vector.broadcast %160 : vector<1x32xf32> to vector<8x32xf32>
    %182 = arith.mulf %180, %181 : vector<8x32xf32>
    %183 = vector.broadcast %162 : vector<1x32xf32> to vector<8x32xf32>
    %184 = arith.addf %182, %183 : vector<8x32xf32>
    %185 = arith.truncf %184 : vector<8x32xf32> to vector<8x32xbf16>
    %c1 = arith.constant 1 : index
    %c0_82 = arith.constant 0 : index
    %c0_83 = arith.constant 0 : index
    %186 = vector.load %arg7[%c1, %c0_82, %c0_83] : memref<2x32x96xbf16, #tpu.memory_space<vmem>>, vector<1x32x96xbf16>
    %187 = vector.shape_cast %186 : vector<1x32x96xbf16> to vector<32x96xbf16>
    %cst_84 = arith.constant dense<0.000000e+00> : vector<8x96xf32>
    %188 = tpu.matmul %185, %187, %cst_84 {dimension_numbers = #tpu.dot_dimension_numbers<[1], [0], [0], [1], [0, 0, 1, 1], [], []>} : vector<8x32xbf16>, vector<32x96xbf16>, vector<8x96xf32> -> vector<8x96xf32>
    %c1_85 = arith.constant 1 : index
    %c0_86 = arith.constant 0 : index
    %c0_87 = arith.constant 0 : index
    %189 = vector.load %arg8[%c1_85, %c0_86, %c0_87] : memref<2x1x96xf32, #tpu.memory_space<vmem>>, vector<1x1x96xf32>
    %190 = vector.shape_cast %189 : vector<1x1x96xf32> to vector<1x96xf32>
    %191 = vector.broadcast %190 : vector<1x96xf32> to vector<8x96xf32>
    %192 = arith.addf %188, %191 : vector<8x96xf32>
    %193 = arith.truncf %192 : vector<8x96xf32> to vector<8x96xbf16>
    %194 = vector.extract_strided_slice %193 {offsets = [0, 0], sizes = [8, 16], strides = [1, 1]} : vector<8x96xbf16> to vector<8x16xbf16>
    %195 = vector.extract_strided_slice %193 {offsets = [0, 32], sizes = [8, 16], strides = [1, 1]} : vector<8x96xbf16> to vector<8x16xbf16>
    %196 = vector.extract_strided_slice %193 {offsets = [0, 64], sizes = [8, 16], strides = [1, 1]} : vector<8x96xbf16> to vector<8x16xbf16>
    %cst_88 = arith.constant dense<0.000000e+00> : vector<8x8xf32>
    %197 = tpu.matmul %194, %195, %cst_88 {dimension_numbers = #tpu.dot_dimension_numbers<[1], [1], [0], [0], [0, 0, 1, 0], [], []>} : vector<8x16xbf16>, vector<8x16xbf16>, vector<8x8xf32> -> vector<8x8xf32>
    %198 = vector.broadcast %47 : vector<1x8xf32> to vector<8x8xf32>
    %199 = arith.addf %197, %198 : vector<8x8xf32>
    %cst_89 = arith.constant dense<0xFF800000> : vector<8xf32>
    %200 = vector.multi_reduction <maximumf>, %199, %cst_89 [1] : vector<8x8xf32> to vector<8xf32>
    %201 = vector.shape_cast %200 : vector<8xf32> to vector<8x1xf32>
    %202 = vector.broadcast %201 : vector<8x1xf32> to vector<8x8xf32>
    %203 = arith.subf %199, %202 : vector<8x8xf32>
    %204 = math.exp %203 : vector<8x8xf32>
    %cst_90 = arith.constant dense<0.000000e+00> : vector<8xf32>
    %205 = vector.multi_reduction <add>, %204, %cst_90 [1] : vector<8x8xf32> to vector<8xf32>
    %206 = vector.shape_cast %205 : vector<8xf32> to vector<8x1xf32>
    %207 = tpu.reciprocal %206 {approx = true} : vector<8x1xf32> -> vector<8x1xf32>
    %208 = vector.broadcast %207 : vector<8x1xf32> to vector<8x8xf32>
    %209 = arith.mulf %204, %208 : vector<8x8xf32>
    %210 = arith.truncf %209 : vector<8x8xf32> to vector<8x8xbf16>
    %cst_91 = arith.constant dense<0.000000e+00> : vector<8x16xf32>
    %211 = tpu.matmul %210, %196, %cst_91 {dimension_numbers = #tpu.dot_dimension_numbers<[1], [0], [0], [1], [0, 0, 1, 1], [], []>} : vector<8x8xbf16>, vector<8x16xbf16>, vector<8x16xf32> -> vector<8x16xf32>
    %212 = vector.extract_strided_slice %193 {offsets = [0, 16], sizes = [8, 16], strides = [1, 1]} : vector<8x96xbf16> to vector<8x16xbf16>
    %213 = vector.extract_strided_slice %193 {offsets = [0, 48], sizes = [8, 16], strides = [1, 1]} : vector<8x96xbf16> to vector<8x16xbf16>
    %214 = vector.extract_strided_slice %193 {offsets = [0, 80], sizes = [8, 16], strides = [1, 1]} : vector<8x96xbf16> to vector<8x16xbf16>
    %cst_92 = arith.constant dense<0.000000e+00> : vector<8x8xf32>
    %215 = tpu.matmul %212, %213, %cst_92 {dimension_numbers = #tpu.dot_dimension_numbers<[1], [1], [0], [0], [0, 0, 1, 0], [], []>} : vector<8x16xbf16>, vector<8x16xbf16>, vector<8x8xf32> -> vector<8x8xf32>
    %216 = vector.broadcast %47 : vector<1x8xf32> to vector<8x8xf32>
    %217 = arith.addf %215, %216 : vector<8x8xf32>
    %cst_93 = arith.constant dense<0xFF800000> : vector<8xf32>
    %218 = vector.multi_reduction <maximumf>, %217, %cst_93 [1] : vector<8x8xf32> to vector<8xf32>
    %219 = vector.shape_cast %218 : vector<8xf32> to vector<8x1xf32>
    %220 = vector.broadcast %219 : vector<8x1xf32> to vector<8x8xf32>
    %221 = arith.subf %217, %220 : vector<8x8xf32>
    %222 = math.exp %221 : vector<8x8xf32>
    %cst_94 = arith.constant dense<0.000000e+00> : vector<8xf32>
    %223 = vector.multi_reduction <add>, %222, %cst_94 [1] : vector<8x8xf32> to vector<8xf32>
    %224 = vector.shape_cast %223 : vector<8xf32> to vector<8x1xf32>
    %225 = tpu.reciprocal %224 {approx = true} : vector<8x1xf32> -> vector<8x1xf32>
    %226 = vector.broadcast %225 : vector<8x1xf32> to vector<8x8xf32>
    %227 = arith.mulf %222, %226 : vector<8x8xf32>
    %228 = arith.truncf %227 : vector<8x8xf32> to vector<8x8xbf16>
    %cst_95 = arith.constant dense<0.000000e+00> : vector<8x16xf32>
    %229 = tpu.matmul %228, %214, %cst_95 {dimension_numbers = #tpu.dot_dimension_numbers<[1], [0], [0], [1], [0, 0, 1, 1], [], []>} : vector<8x8xbf16>, vector<8x16xbf16>, vector<8x16xf32> -> vector<8x16xf32>
    %230 = tpu.concatenate %211, %229 in 1 : vector<8x16xf32>, vector<8x16xf32> -> vector<8x32xf32>
    %231 = arith.truncf %230 : vector<8x32xf32> to vector<8x32xbf16>
    %c1_96 = arith.constant 1 : index
    %c0_97 = arith.constant 0 : index
    %c0_98 = arith.constant 0 : index
    %232 = vector.load %arg9[%c1_96, %c0_97, %c0_98] : memref<2x32x32xbf16, #tpu.memory_space<vmem>>, vector<1x32x32xbf16>
    %233 = vector.shape_cast %232 : vector<1x32x32xbf16> to vector<32x32xbf16>
    %cst_99 = arith.constant dense<0.000000e+00> : vector<8x32xf32>
    %234 = tpu.matmul %231, %233, %cst_99 {dimension_numbers = #tpu.dot_dimension_numbers<[1], [0], [0], [1], [0, 0, 1, 1], [], []>} : vector<8x32xbf16>, vector<32x32xbf16>, vector<8x32xf32> -> vector<8x32xf32>
    %c1_100 = arith.constant 1 : index
    %c0_101 = arith.constant 0 : index
    %c0_102 = arith.constant 0 : index
    %235 = vector.load %arg10[%c1_100, %c0_101, %c0_102] : memref<2x1x32xf32, #tpu.memory_space<vmem>>, vector<1x1x32xf32>
    %236 = vector.shape_cast %235 : vector<1x1x32xf32> to vector<1x32xf32>
    %237 = vector.broadcast %236 : vector<1x32xf32> to vector<8x32xf32>
    %238 = arith.addf %234, %237 : vector<8x32xf32>
    %239 = arith.addf %184, %238 : vector<8x32xf32>
    %c1_103 = arith.constant 1 : index
    %c0_104 = arith.constant 0 : index
    %c0_105 = arith.constant 0 : index
    %240 = vector.load %arg11[%c1_103, %c0_104, %c0_105] : memref<2x1x32xf32, #tpu.memory_space<vmem>>, vector<1x1x32xf32>
    %241 = vector.shape_cast %240 : vector<1x1x32xf32> to vector<1x32xf32>
    %c1_106 = arith.constant 1 : index
    %c0_107 = arith.constant 0 : index
    %c0_108 = arith.constant 0 : index
    %242 = vector.load %arg12[%c1_106, %c0_107, %c0_108] : memref<2x1x32xf32, #tpu.memory_space<vmem>>, vector<1x1x32xf32>
    %243 = vector.shape_cast %242 : vector<1x1x32xf32> to vector<1x32xf32>
    %cst_109 = arith.constant dense<0.000000e+00> : vector<8xf32>
    %244 = vector.multi_reduction <add>, %239, %cst_109 [1] : vector<8x32xf32> to vector<8xf32>
    %245 = vector.shape_cast %244 : vector<8xf32> to vector<8x1xf32>
    %cst_110 = arith.constant 3.200000e+01 : f32
    %246 = vector.broadcast %cst_110 : f32 to vector<8x1xf32>
    %247 = arith.divf %245, %246 : vector<8x1xf32>
    %248 = vector.broadcast %247 : vector<8x1xf32> to vector<8x32xf32>
    %249 = arith.subf %239, %248 : vector<8x32xf32>
    %250 = arith.mulf %249, %249 : vector<8x32xf32>
    %cst_111 = arith.constant dense<0.000000e+00> : vector<8xf32>
    %251 = vector.multi_reduction <add>, %250, %cst_111 [1] : vector<8x32xf32> to vector<8xf32>
    %252 = vector.shape_cast %251 : vector<8xf32> to vector<8x1xf32>
    %cst_112 = arith.constant 3.200000e+01 : f32
    %253 = vector.broadcast %cst_112 : f32 to vector<8x1xf32>
    %254 = arith.divf %252, %253 : vector<8x1xf32>
    %255 = vector.broadcast %247 : vector<8x1xf32> to vector<8x32xf32>
    %256 = arith.subf %239, %255 : vector<8x32xf32>
    %cst_113 = arith.constant 9.99999996E-13 : f32
    %257 = vector.broadcast %cst_113 : f32 to vector<8x1xf32>
    %258 = arith.addf %254, %257 : vector<8x1xf32>
    %259 = math.rsqrt %258 : vector<8x1xf32>
    %260 = vector.broadcast %259 : vector<8x1xf32> to vector<8x32xf32>
    %261 = arith.mulf %256, %260 : vector<8x32xf32>
    %262 = vector.broadcast %241 : vector<1x32xf32> to vector<8x32xf32>
    %263 = arith.mulf %261, %262 : vector<8x32xf32>
    %264 = vector.broadcast %243 : vector<1x32xf32> to vector<8x32xf32>
    %265 = arith.addf %263, %264 : vector<8x32xf32>
    %266 = arith.truncf %265 : vector<8x32xf32> to vector<8x32xbf16>
    %c1_114 = arith.constant 1 : index
    %c0_115 = arith.constant 0 : index
    %c0_116 = arith.constant 0 : index
    %267 = vector.load %arg13[%c1_114, %c0_115, %c0_116] : memref<2x32x64xbf16, #tpu.memory_space<vmem>>, vector<1x32x64xbf16>
    %268 = vector.shape_cast %267 : vector<1x32x64xbf16> to vector<32x64xbf16>
    %cst_117 = arith.constant dense<0.000000e+00> : vector<8x64xf32>
    %269 = tpu.matmul %266, %268, %cst_117 {dimension_numbers = #tpu.dot_dimension_numbers<[1], [0], [0], [1], [0, 0, 1, 1], [], []>} : vector<8x32xbf16>, vector<32x64xbf16>, vector<8x64xf32> -> vector<8x64xf32>
    %c1_118 = arith.constant 1 : index
    %c0_119 = arith.constant 0 : index
    %c0_120 = arith.constant 0 : index
    %270 = vector.load %arg14[%c1_118, %c0_119, %c0_120] : memref<2x1x64xf32, #tpu.memory_space<vmem>>, vector<1x1x64xf32>
    %271 = vector.shape_cast %270 : vector<1x1x64xf32> to vector<1x64xf32>
    %272 = vector.broadcast %271 : vector<1x64xf32> to vector<8x64xf32>
    %273 = arith.addf %269, %272 : vector<8x64xf32>
    %274 = arith.mulf %273, %273 : vector<8x64xf32>
    %275 = arith.mulf %273, %274 : vector<8x64xf32>
    %cst_121 = arith.constant 4.471500e-02 : f32
    %276 = vector.broadcast %cst_121 : f32 to vector<8x64xf32>
    %277 = arith.mulf %276, %275 : vector<8x64xf32>
    %278 = arith.addf %273, %277 : vector<8x64xf32>
    %cst_122 = arith.constant 0.797884583 : f32
    %279 = vector.broadcast %cst_122 : f32 to vector<8x64xf32>
    %280 = arith.mulf %279, %278 : vector<8x64xf32>
    %281 = math.tanh %280 : vector<8x64xf32>
    %cst_123 = arith.constant 1.000000e+00 : f32
    %282 = vector.broadcast %cst_123 : f32 to vector<8x64xf32>
    %283 = arith.addf %282, %281 : vector<8x64xf32>
    %cst_124 = arith.constant 5.000000e-01 : f32
    %284 = vector.broadcast %cst_124 : f32 to vector<8x64xf32>
    %285 = arith.mulf %284, %283 : vector<8x64xf32>
    %286 = arith.mulf %273, %285 : vector<8x64xf32>
    %287 = arith.truncf %286 : vector<8x64xf32> to vector<8x64xbf16>
    %c1_125 = arith.constant 1 : index
    %c0_126 = arith.constant 0 : index
    %c0_127 = arith.constant 0 : index
    %288 = vector.load %arg15[%c1_125, %c0_126, %c0_127] : memref<2x64x32xbf16, #tpu.memory_space<vmem>>, vector<1x64x32xbf16>
    %289 = vector.shape_cast %288 : vector<1x64x32xbf16> to vector<64x32xbf16>
    %cst_128 = arith.constant dense<0.000000e+00> : vector<8x32xf32>
    %290 = tpu.matmul %287, %289, %cst_128 {dimension_numbers = #tpu.dot_dimension_numbers<[1], [0], [0], [1], [0, 0, 1, 1], [], []>} : vector<8x64xbf16>, vector<64x32xbf16>, vector<8x32xf32> -> vector<8x32xf32>
    %c1_129 = arith.constant 1 : index
    %c0_130 = arith.constant 0 : index
    %c0_131 = arith.constant 0 : index
    %291 = vector.load %arg16[%c1_129, %c0_130, %c0_131] : memref<2x1x32xf32, #tpu.memory_space<vmem>>, vector<1x1x32xf32>
    %292 = vector.shape_cast %291 : vector<1x1x32xf32> to vector<1x32xf32>
    %293 = vector.broadcast %292 : vector<1x32xf32> to vector<8x32xf32>
    %294 = arith.addf %290, %293 : vector<8x32xf32>
    %295 = arith.addf %265, %294 : vector<8x32xf32>
    %c1_132 = arith.constant 1 : index
    %c0_133 = arith.constant 0 : index
    %c0_134 = arith.constant 0 : index
    %296 = vector.load %arg17[%c1_132, %c0_133, %c0_134] : memref<2x1x32xf32, #tpu.memory_space<vmem>>, vector<1x1x32xf32>
    %297 = vector.shape_cast %296 : vector<1x1x32xf32> to vector<1x32xf32>
    %c1_135 = arith.constant 1 : index
    %c0_136 = arith.constant 0 : index
    %c0_137 = arith.constant 0 : index
    %298 = vector.load %arg18[%c1_135, %c0_136, %c0_137] : memref<2x1x32xf32, #tpu.memory_space<vmem>>, vector<1x1x32xf32>
    %299 = vector.shape_cast %298 : vector<1x1x32xf32> to vector<1x32xf32>
    %cst_138 = arith.constant dense<0.000000e+00> : vector<8xf32>
    %300 = vector.multi_reduction <add>, %295, %cst_138 [1] : vector<8x32xf32> to vector<8xf32>
    %301 = vector.shape_cast %300 : vector<8xf32> to vector<8x1xf32>
    %cst_139 = arith.constant 3.200000e+01 : f32
    %302 = vector.broadcast %cst_139 : f32 to vector<8x1xf32>
    %303 = arith.divf %301, %302 : vector<8x1xf32>
    %304 = vector.broadcast %303 : vector<8x1xf32> to vector<8x32xf32>
    %305 = arith.subf %295, %304 : vector<8x32xf32>
    %306 = arith.mulf %305, %305 : vector<8x32xf32>
    %cst_140 = arith.constant dense<0.000000e+00> : vector<8xf32>
    %307 = vector.multi_reduction <add>, %306, %cst_140 [1] : vector<8x32xf32> to vector<8xf32>
    %308 = vector.shape_cast %307 : vector<8xf32> to vector<8x1xf32>
    %cst_141 = arith.constant 3.200000e+01 : f32
    %309 = vector.broadcast %cst_141 : f32 to vector<8x1xf32>
    %310 = arith.divf %308, %309 : vector<8x1xf32>
    %311 = vector.broadcast %303 : vector<8x1xf32> to vector<8x32xf32>
    %312 = arith.subf %295, %311 : vector<8x32xf32>
    %cst_142 = arith.constant 9.99999996E-13 : f32
    %313 = vector.broadcast %cst_142 : f32 to vector<8x1xf32>
    %314 = arith.addf %310, %313 : vector<8x1xf32>
    %315 = math.rsqrt %314 : vector<8x1xf32>
    %316 = vector.broadcast %315 : vector<8x1xf32> to vector<8x32xf32>
    %317 = arith.mulf %312, %316 : vector<8x32xf32>
    %318 = vector.broadcast %297 : vector<1x32xf32> to vector<8x32xf32>
    %319 = arith.mulf %317, %318 : vector<8x32xf32>
    %320 = vector.broadcast %299 : vector<1x32xf32> to vector<8x32xf32>
    %321 = arith.addf %319, %320 : vector<8x32xf32>
    %322 = vector.extract_strided_slice %321 {offsets = [0, 0], sizes = [1, 32], strides = [1, 1]} : vector<8x32xf32> to vector<1x32xf32>
    %323 = arith.truncf %322 : vector<1x32xf32> to vector<1x32xbf16>
    %c0_143 = arith.constant 0 : index
    %c0_144 = arith.constant 0 : index
    %324 = vector.load %arg19[%c0_143, %c0_144] : memref<32x32xbf16, #tpu.memory_space<vmem>>, vector<32x32xbf16>
    %cst_145 = arith.constant dense<0.000000e+00> : vector<1x32xf32>
    %325 = tpu.matmul %323, %324, %cst_145 {dimension_numbers = #tpu.dot_dimension_numbers<[1], [0], [0], [1], [0, 0, 1, 1], [], []>} : vector<1x32xbf16>, vector<32x32xbf16>, vector<1x32xf32> -> vector<1x32xf32>
    %c0_146 = arith.constant 0 : index
    %c0_147 = arith.constant 0 : index
    %326 = vector.load %arg20[%c0_146, %c0_147] : memref<1x32xf32, #tpu.memory_space<vmem>>, vector<1x32xf32>
    %327 = arith.addf %325, %326 : vector<1x32xf32>
    %328 = math.tanh %327 : vector<1x32xf32>
    %329 = arith.truncf %328 : vector<1x32xf32> to vector<1x32xbf16>
    %c0_148 = arith.constant 0 : index
    %c0_149 = arith.constant 0 : index
    %330 = vector.load %arg21[%c0_148, %c0_149] : memref<32x128xbf16, #tpu.memory_space<vmem>>, vector<32x128xbf16>
    %cst_150 = arith.constant dense<0.000000e+00> : vector<1x128xf32>
    %331 = tpu.matmul %329, %330, %cst_150 {dimension_numbers = #tpu.dot_dimension_numbers<[1], [0], [0], [1], [0, 0, 1, 1], [], []>} : vector<1x32xbf16>, vector<32x128xbf16>, vector<1x128xf32> -> vector<1x128xf32>
    %c0_151 = arith.constant 0 : index
    %c0_152 = arith.constant 0 : index
    %332 = vector.load %arg22[%c0_151, %c0_152] : memref<1x128xf32, #tpu.memory_space<vmem>>, vector<1x128xf32>
    %333 = arith.addf %331, %332 : vector<1x128xf32>
    %334 = vector.shape_cast %333 : vector<1x128xf32> to vector<1x1x128xf32>
    %335 = vector.shape_cast %334 : vector<1x1x128xf32> to vector<1x1x128xf32>
    %336 = vector.broadcast %335 : vector<1x1x128xf32> to vector<1x8x128xf32>
    %c0_153 = arith.constant 0 : index
    %c0_154 = arith.constant 0 : index
    %c0_155 = arith.constant 0 : index
    %337 = vector.load %arg23[%c0_153, %c0_154, %c0_155] : memref<1x8x128xf32, #tpu.memory_space<vmem>>, vector<1x8x128xf32>
    tpu.vector_store %arg23[%c0_153, %c0_154, %c0_155], %336 {strides = array<i32>} : memref<1x8x128xf32, #tpu.memory_space<vmem>>, vector<1x8x128xf32>,
    return
  }
  func.func @transform_0(%arg0: i32) -> (i32, i32, i32) {
    %c0_i32 = arith.constant 0 : i32
    %c0_i32_0 = arith.constant 0 : i32
    %c0_i32_1 = arith.constant 0 : i32
    return %arg0, %c0_i32, %c0_i32_0 : i32, i32, i32
  }
  func.func @transform_1(%arg0: i32) -> (i32, i32, i32) {
    %c0_i32 = arith.constant 0 : i32
    %c0_i32_0 = arith.constant 0 : i32
    %c0_i32_1 = arith.constant 0 : i32
    return %arg0, %c0_i32, %c0_i32_0 : i32, i32, i32
  }
  func.func @transform_2(%arg0: i32) -> (i32, i32) {
    %c0_i32 = arith.constant 0 : i32
    %c0_i32_0 = arith.constant 0 : i32
    %c0_i32_1 = arith.constant 0 : i32
    return %c0_i32, %c0_i32_0 : i32, i32
  }
  func.func @transform_3(%arg0: i32) -> (i32, i32) {
    %c0_i32 = arith.constant 0 : i32
    %c0_i32_0 = arith.constant 0 : i32
    %c0_i32_1 = arith.constant 0 : i32
    return %c0_i32, %c0_i32_0 : i32, i32
  }
  func.func @transform_4(%arg0: i32) -> (i32, i32) {
    %c0_i32 = arith.constant 0 : i32
    %c0_i32_0 = arith.constant 0 : i32
    %c0_i32_1 = arith.constant 0 : i32
    return %c0_i32, %c0_i32_0 : i32, i32
  }
  func.func @transform_5(%arg0: i32) -> (i32, i32) {
    %c0_i32 = arith.constant 0 : i32
    %c0_i32_0 = arith.constant 0 : i32
    %c0_i32_1 = arith.constant 0 : i32
    return %c0_i32, %c0_i32_0 : i32, i32
  }
  func.func @transform_6(%arg0: i32) -> (i32, i32, i32) {
    %c0_i32 = arith.constant 0 : i32
    %c0_i32_0 = arith.constant 0 : i32
    %c0_i32_1 = arith.constant 0 : i32
    %c0_i32_2 = arith.constant 0 : i32
    return %c0_i32, %c0_i32_0, %c0_i32_1 : i32, i32, i32
  }
  func.func @transform_7(%arg0: i32) -> (i32, i32, i32) {
    %c0_i32 = arith.constant 0 : i32
    %c0_i32_0 = arith.constant 0 : i32
    %c0_i32_1 = arith.constant 0 : i32
    %c0_i32_2 = arith.constant 0 : i32
    return %c0_i32, %c0_i32_0, %c0_i32_1 : i32, i32, i32
  }
  func.func @transform_8(%arg0: i32) -> (i32, i32, i32) {
    %c0_i32 = arith.constant 0 : i32
    %c0_i32_0 = arith.constant 0 : i32
    %c0_i32_1 = arith.constant 0 : i32
    %c0_i32_2 = arith.constant 0 : i32
    return %c0_i32, %c0_i32_0, %c0_i32_1 : i32, i32, i32
  }
  func.func @transform_9(%arg0: i32) -> (i32, i32, i32) {
    %c0_i32 = arith.constant 0 : i32
    %c0_i32_0 = arith.constant 0 : i32
    %c0_i32_1 = arith.constant 0 : i32
    %c0_i32_2 = arith.constant 0 : i32
    return %c0_i32, %c0_i32_0, %c0_i32_1 : i32, i32, i32
  }
  func.func @transform_10(%arg0: i32) -> (i32, i32, i32) {
    %c0_i32 = arith.constant 0 : i32
    %c0_i32_0 = arith.constant 0 : i32
    %c0_i32_1 = arith.constant 0 : i32
    %c0_i32_2 = arith.constant 0 : i32
    return %c0_i32, %c0_i32_0, %c0_i32_1 : i32, i32, i32
  }
  func.func @transform_11(%arg0: i32) -> (i32, i32, i32) {
    %c0_i32 = arith.constant 0 : i32
    %c0_i32_0 = arith.constant 0 : i32
    %c0_i32_1 = arith.constant 0 : i32
    %c0_i32_2 = arith.constant 0 : i32
    return %c0_i32, %c0_i32_0, %c0_i32_1 : i32, i32, i32
  }
  func.func @transform_12(%arg0: i32) -> (i32, i32, i32) {
    %c0_i32 = arith.constant 0 : i32
    %c0_i32_0 = arith.constant 0 : i32
    %c0_i32_1 = arith.constant 0 : i32
    %c0_i32_2 = arith.constant 0 : i32
    return %c0_i32, %c0_i32_0, %c0_i32_1 : i32, i32, i32
  }
  func.func @transform_13(%arg0: i32) -> (i32, i32, i32) {
    %c0_i32 = arith.constant 0 : i32
    %c0_i32_0 = arith.constant 0 : i32
    %c0_i32_1 = arith.constant 0 : i32
    %c0_i32_2 = arith.constant 0 : i32
    return %c0_i32, %c0_i32_0, %c0_i32_1 : i32, i32, i32
  }
  func.func @transform_14(%arg0: i32) -> (i32, i32, i32) {
    %c0_i32 = arith.constant 0 : i32
    %c0_i32_0 = arith.constant 0 : i32
    %c0_i32_1 = arith.constant 0 : i32
    %c0_i32_2 = arith.constant 0 : i32
    return %c0_i32, %c0_i32_0, %c0_i32_1 : i32, i32, i32
  }
  func.func @transform_15(%arg0: i32) -> (i32, i32, i32) {
    %c0_i32 = arith.constant 0 : i32
    %c0_i32_0 = arith.constant 0 : i32
    %c0_i32_1 = arith.constant 0 : i32
    %c0_i32_2 = arith.constant 0 : i32
    return %c0_i32, %c0_i32_0, %c0_i32_1 : i32, i32, i32
  }
  func.func @transform_16(%arg0: i32) -> (i32, i32, i32) {
    %c0_i32 = arith.constant 0 : i32
    %c0_i32_0 = arith.constant 0 : i32
    %c0_i32_1 = arith.constant 0 : i32
    %c0_i32_2 = arith.constant 0 : i32
    return %c0_i32, %c0_i32_0, %c0_i32_1 : i32, i32, i32
  }
  func.func @transform_17(%arg0: i32) -> (i32, i32, i32) {
    %c0_i32 = arith.constant 0 : i32
    %c0_i32_0 = arith.constant 0 : i32
    %c0_i32_1 = arith.constant 0 : i32
    %c0_i32_2 = arith.constant 0 : i32
    return %c0_i32, %c0_i32_0, %c0_i32_1 : i32, i32, i32
  }
  func.func @transform_18(%arg0: i32) -> (i32, i32) {
    %c0_i32 = arith.constant 0 : i32
    %c0_i32_0 = arith.constant 0 : i32
    %c0_i32_1 = arith.constant 0 : i32
    return %c0_i32, %c0_i32_0 : i32, i32
  }
  func.func @transform_19(%arg0: i32) -> (i32, i32) {
    %c0_i32 = arith.constant 0 : i32
    %c0_i32_0 = arith.constant 0 : i32
    %c0_i32_1 = arith.constant 0 : i32
    return %c0_i32, %c0_i32_0 : i32, i32
  }
  func.func @transform_20(%arg0: i32) -> (i32, i32) {
    %c0_i32 = arith.constant 0 : i32
    %c0_i32_0 = arith.constant 0 : i32
    %c0_i32_1 = arith.constant 0 : i32
    return %c0_i32, %c0_i32_0 : i32, i32
  }
  func.func @transform_21(%arg0: i32) -> (i32, i32) {
    %c0_i32 = arith.constant 0 : i32
    %c0_i32_0 = arith.constant 0 : i32
    %c0_i32_1 = arith.constant 0 : i32
    return %c0_i32, %c0_i32_0 : i32, i32
  }
  func.func @transform_22(%arg0: i32) -> (i32, i32, i32) {
    %c0_i32 = arith.constant 0 : i32
    %c0_i32_0 = arith.constant 0 : i32
    %c0_i32_1 = arith.constant 0 : i32
    return %arg0, %c0_i32, %c0_i32_0 : i32, i32, i32
  }
}

</mosaic_0001>

<bundles_post_ra>
// kernel: _berta_forward_impl.1
= control target key start
LH: loop header
LB: loop body
LE: loop exit
PB: predicated region body
PF: predicated region fallthrough
CT: control target
= control target key end

     0   :  { %s3007_s0 = inlined_call_operand.vmem [shape: s32[2,8,2], index: 0, kind: input, shape index: {}]   ;;  %s3008_s1 = inlined_call_operand.vmem [shape: f32[2,1,8], index: 1, kind: input, shape index: {}]   ;;  %s3009_s2 = inlined_call_operand.vmem [shape: bf16[32,32], index: 2, kind: input, shape index: {}]   ;;  %s3010_s3 = inlined_call_operand.vmem [shape: bf16[8,32], index: 3, kind: input, shape index: {}]   ;;  %s3011_s4 = inlined_call_operand.vmem [shape: f32[1,32], index: 4, kind: input, shape index: {}]   ;;  %s3012_s5 = inlined_call_operand.vmem [shape: f32[1,32], index: 5, kind: input, shape index: {}]   ;;  %s3013_s6 = inlined_call_operand.vmem [shape: bf16[2,32,96], index: 6, kind: input, shape index: {}]   ;;  %s3014_s7 = inlined_call_operand.vmem [shape: f32[2,1,96], index: 7, kind: input, shape index: {}]   ;;  %s3015_s8 = inlined_call_operand.vmem [shape: bf16[2,32,32], index: 8, kind: input, shape index: {}]   ;;  %s3016_s9 = inlined_call_operand.vmem [shape: f32[2,1,32], index: 9, kind: input, shape index: {}]   ;;  %s3017_s10 = inlined_call_operand.vmem [shape: f32[2,1,32], index: 10, kind: input, shape index: {}]   ;;  %s3018_s11 = inlined_call_operand.vmem [shape: f32[2,1,32], index: 11, kind: input, shape index: {}]   ;;  %s3019_s12 = inlined_call_operand.vmem [shape: bf16[2,32,64], index: 12, kind: input, shape index: {}]   ;;  %s3020_s13 = inlined_call_operand.vmem [shape: f32[2,1,64], index: 13, kind: input, shape index: {}]   ;;  %s3021_s14 = inlined_call_operand.vmem [shape: bf16[2,64,32], index: 14, kind: input, shape index: {}]   ;;  %s3022_s15 = inlined_call_operand.vmem [shape: f32[2,1,32], index: 15, kind: input, shape index: {}]   ;;  %s3023_s16 = inlined_call_operand.vmem [shape: f32[2,1,32], index: 16, kind: input, shape index: {}]   ;;  %s3024_s17 = inlined_call_operand.vmem [shape: f32[2,1,32], index: 17, kind: input, shape index: {}]   ;;  %s3025_s18 = inlined_call_operand.vmem [shape: bf16[32,32], index: 18, kind: input, shape index: {}]   ;;  %s3026_s19 = inlined_call_operand.vmem [shape: f32[1,32], index: 19, kind: input, shape index: {}]   ;;  %s3027_s20 = inlined_call_operand.vmem [shape: bf16[32,128], index: 20, kind: input, shape index: {}]   ;;  %s3028_s21 = inlined_call_operand.vmem [shape: f32[1,128], index: 21, kind: input, shape index: {}]   ;;  %s3029_s22 = inlined_call_operand.vmem [shape: f32[2,8,128], index: 22, kind: output, shape index: {}]  }
   0x1   :  { %3035 = sst [smem:[#allocation2_spill]] %s3007_s0 }
   0x2   :  { %3036 = sst [smem:[#allocation3_spill]] %s3008_s1 }
   0x3   :  { %3037 = sst [smem:[#allocation4_spill]] %s3009_s2 }
   0x4   :  { %3038 = sst [smem:[#allocation5_spill]] %s3010_s3  ;;  %s2681_s3 = smov 0  }
   0x5   :  { %3039 = sst [smem:[#allocation6_spill]] %s3011_s4 }
   0x6   :  { %3040 = sst [smem:[#allocation7_spill]] %s3012_s5 }
   0x7   :  { %3041 = sst [smem:[#allocation8_spill]] %s3013_s6 }
   0x8 LB: > { %s2172_s28 = sadd.s32 4294967295, %s2554_s3   ;;  %p2176_p0 = scmp.ge.s32.totalorder %s2554_s3, 1  ;;  %s2554_s3 = sphi %s2681_s3, %s32_s3  }
   0x9   : > { %p619_p1 = scmp.lt.s32.totalorder %s2554_s3, 3 }
   0xb   : > { %p620_p2 = pnand %p2176_p0, %p619_p1 }
   0xc   : > { %p682_p3 = scmp.lt.s32.totalorder (!%p620_p2), %s2172_s28, 1  ;;  %v2556_v0 = vmov (!%p620_p2), 0   ;;  %s3042_s0 = sld [smem:[#allocation2_spill]] (!%p620_p2)  ;;  %v2557_v3 = vmov (!%p620_p2), 0.0   ;;  %v2558_v4 = vmov (!%p620_p2), 1   ;;  %vm2559_vm0 = vmmov (!%p620_p2), 0  }
   0xd   : > { %623 = sbr.rel (%p620_p2) target bundleno = 6160 (0x1810), region = 108  ;;  %2488 = vset.pattern.permute.xlu0 (!%p620_p2), %v2556_v0  ;;  %s3043_s24 = sld [smem:[#allocation4_spill]] (!%p620_p2)  ;;  %2326 = vmatprep.subr.bf16.mxu0 (!%p620_p2), %v2557_v3  ;;  %v696_v6 = vlaneseq (!%p620_p2)  ;;  %vm728_vm4 = vcmask (!%p620_p2), 261120   ;;  %v2185_v37 = vld [vmem:[%s3014_s7] ss:$0 sm:$0xff] (!%p620_p2)  ;;  %vm881_vm5 = vcmask (!%p620_p2), 130048  }
   0xe   : > { %2334 = vmatprep.subr.bf16.mxu1 (!%p620_p2), %v2557_v3  ;;  %2330 = vmatprep.mubr.msk.bf16.mxu0 (!%p620_p2), %vm2559_vm0, %v2557_v3  ;;  %s3044_s27 = sld [smem:[#allocation5_spill]] (!%p620_p2)  ;;  %s3046_s25 = sld [smem:[#allocation6_spill]] (!%p620_p2)  ;;  %vm928_vm6 = vcmask (!%p620_p2), 64512   ;;  %vm946_vm7 = vcmask (!%p620_p2), 1043456   ;;  %vm1318_vm8 = vcmask (!%p620_p2), 523264  }
   0xf   : > { %2338 = vmatprep.mubr.msk.bf16.mxu1 (!%p620_p2), %vm2559_vm0, %v2557_v3  ;;  %v697_v8 = vand.u32 (!%p620_p2), 127, %v696_v6  ;;  %s2561_s1 = smov (!%p620_p2), 96   ;;  %s2562_s5 = smov (!%p620_p2), 112   ;;  %v2763_v51 = vshrl.u32 (!%p620_p2), %v696_v6, 7 }
  0x10   : > { %s3048_s26 = sld [smem:[#allocation3_spill]] (!%p620_p2)  ;;  %s2564_s30 = smov (!%p620_p2), 64  }
  0x11   : > { %v875_v53 = vsub.s32 (!%p620_p2), 0, %v2763_v51 }
  0x13   : > { %v2490_v2 = vld [vmem:[%s3043_s24] sm:$0xff] (!%p620_p2)   ;;  %v2491_v5 = vld [vmem:[%s3043_s24 + $0x8] sm:$0xff] (!%p620_p2)  }
  0x14   : > { %s3053_s28 = smov (!%p682_p3, %s2172_s28), 1  ;;  %2327 = vmatpush3.bf16.msra.mxu0 %v2490_v2  ;;  %v714_v12 = vld [vmem:[%s3044_s27] sm:$0xf]  ;;  %s3047_s27 = sld [smem:[#allocation7_spill]] }
  0x15   : > { %s3032_s29 = sshll.u32 %s3053_s28, 3  ;;  %2328 = vmatprep.subr.bf16.mxu0 %v2557_v3  ;;  %v715_v13 = vunpack.c.l.bf16 %v714_v12  ;;  %v2183_v31 = vld [vmem:[%s3046_s25] ss:$0 sm:$0xff] }
  0x16   : > { %s685_s23 = scalar_lea.vmem %s3042_s0, %s3032_s29  ;;  %s3045_s0 = sld [smem:[#allocation8_spill]] }
  0x17   : > { %v694_v1 = vld [vmem:[%s685_s23] sm:$0xff]  ;;  %s2560_s23 = smov 80   ;;  %s688_s2 = scalar_lea.vmem %s3048_s26, %s3053_s28 }
  0x18   : > { %699 = vperm.xlu0 %2488, %v694_v1   ;;  %2329 = vmatpush3.bf16.msra.mxu0 %v2491_v5  ;;  %v695_v49 = vld [vmem:[%s688_s2] sm:$0x1]  ;;  %s3033_s2 = smov 16   ;;  %s3050_s29 = smov 16  }
  0x19   : > { %2342 = vmatprep.subr.bf16.mxu0 %v2557_v3  ;;  %v802_v50 = vsub.f32 1.0, %v695_v49 }
  0x1a   : > { %v2184_v33 = vld [vmem:[%s3047_s27] ss:$0 sm:$0xff]  ;;  %s3034_s27 = smov 48  }
  0x1b   : > { %v803_v52 = vmul.f32 -10000.0, %v802_v50 }
  0x1c   : > { %2489 = vset.pattern.permute.xlu0 %v2558_v4  ;;  %v2492_v25 = vld [vmem:[%s3045_s0] sm:$0xff]   ;;  %v2493_v26 = vld [vmem:[%s3045_s0 + $0x8] sm:$0xff]  }
  0x1d   : > { %703 = vperm.xlu0 %2489, %v694_v1   ;;  %2335 = vmatpush3.bf16.msra.mxu1 %v2492_v25  ;;  %v2768_v54 = vrot.slane %v803_v52, %v875_v53 }
  0x1e   : > { %2336 = vmatprep.subr.bf16.mxu1 %v2557_v3 }
  0x21   : > { %2337 = vmatpush3.bf16.msra.mxu1 %v2493_v26  ;;  %v2494_v26 = vld [vmem:[%s3015_s8] sm:$0xff]  }
  0x22   : > { %2348 = vmatprep.subr.bf16.mxu1 %v2557_v3 }
  0x97   : > { %v700_v7 = vpop.permute.xlu0 %699 }
  0x98   : > { %vm701_vm1 = vcmp.eq.s32.totalorder %v700_v7, %v697_v8 }
  0x9c   : > { %v704_v9 = vpop.permute.xlu0 %703 }
  0x9d   : > { %vm705_vm2 = vcmp.eq.s32.totalorder %v704_v9, %v697_v8 }
  0x9e   : > { %vm706_vm3 = vmor %vm701_vm1, %vm705_vm2 }
  0x9f   : > { %v2179_v10 = vsel %vm706_vm3, 1.0, %v2557_v3 }
  0xa0   : > { %v709_v11 = vpack.c.bf16 %v2179_v10, %v2179_v10 }
  0xa2   : > { %2331 = vmatmul.mubr.msk.bf16.vlgmr.msra.gmra.mrb[0].mxu0 %vm728_vm4, %v709_v11 }
  0xa3   : > { %2344 = vmatprep.mubr.msk.bf16.mxu0 %vm2559_vm0, %v2557_v3 }
 0x175   : > { %v766_v14 = vpop.f32.mrb[0].mxu0 }
 0x176   : > { %v767_v15 = vadd.f32 %v766_v14, %v715_v13  ;;  %v2332_v16 = vpop.f32.mrb[1].mxu0 }
 0x177   : > { %v769_v17 = vpop.f32.mrb[2].mxu0 }
 0x178   : > { %v2333_v18 = vpop.f32.mrb[3].mxu0  ;;  %v774_v19 = vsel %vm728_vm4, %v767_v15, 0.0 }
 0x179   : > { %775 = vadd.xlane.f32.xlu1 %v774_v19 }
 0x206   : > { %v776_v20 = vpop.xlane.xlu1 %775 }
 0x207   : > { %v778_v21 = vmul.f32 0.03125, %v776_v20 }
 0x209   : > { %v779_v22 = vsub.f32 %v767_v15, %v778_v21 }
 0x20b   : > { %v780_v23 = vmul.f32 %v779_v22, %v779_v22 }
 0x20d   : > { %v781_v24 = vsel %vm728_vm4, %v780_v23, 0.0 }
 0x20e   : > { %782 = vadd.xlane.f32.xlu1 %v781_v24 }
 0x29b   : > { %v783_v27 = vpop.xlane.xlu1 %782 }
 0x29c   : > { %v784_v28 = vmul.f32 0.03125, %v783_v27  ;;  %v2495_v27 = vld [vmem:[%s3015_s8 + $0x8] sm:$0xff]  }
 0x29e   : > { %v785_v29 = vadd.f32 1e-12, %v784_v28 }
 0x2a0   : > { %2516 = vrsqrt.f32 %v785_v29 }
 0x2aa   : > { %v2517_v30 = vpop.eup %2516 }
 0x2ab   : > { %v787_v32 = vmul.f32 %v2517_v30, %v779_v22 }
 0x2ad   : > { %v794_v34 = vmul.f32 %v2183_v31, %v787_v32 }
 0x2af   : > { %v2735_v35 = vadd.f32 %v2184_v33, %v794_v34 }
 0x2b1   : > { %v804_v36 = vpack.c.bf16 %v2735_v35, %v2735_v35 }
 0x2b3   : > { %2339 = vmatmul.mubr.msk.bf16.vlgmr.msra.gmra.mrb[0].mxu1 %vm728_vm4, %v804_v36 }
 0x2b4   : > { %2350 = vmatprep.mubr.msk.bf16.mxu1 %vm2559_vm0, %v2557_v3 }
 0x386   : > { %v865_v38 = vpop.f32.mrb[0].mxu1 }
 0x387   : > { %v866_v39 = vadd.f32 %v2185_v37, %v865_v38  ;;  %v2340_v40 = vpop.f32.mrb[1].mxu1 }
 0x388   : > { %v868_v41 = vpop.f32.mrb[2].mxu1  ;;  %v2193_v40 = vld [vmem:[%s3016_s9] ss:$0 sm:$0xff] }
 0x389   : > { %v871_v42 = vpack.c.bf16 %v866_v39, %v866_v39  ;;  %v2341_v43 = vpop.f32.mrb[3].mxu1 }
 0x38b   : > { %992 = vrot.lane.b32.xlu0 %v871_v42, %s2560_s23  ;;  %879 = vrot.lane.b32.xlu1 %v871_v42, %s2561_s1 }
 0x38f   : > { %990 = vrot.lane.b32.xlu0 %v871_v42, %s2562_s5 }
 0x3fd   : > { %v880_v44 = vpop.permute.xlu1 %879  ;;  %v993_v46 = vpop.permute.xlu0 %992 }
 0x3fe   : > { %v886_v45 = vsel %vm881_vm5, %v880_v44, 0  ;;  %v998_v47 = vsel %vm881_vm5, %v993_v46, 0 }
 0x3ff   : > { %2343 = vmatpush3.bf16.xpose.msra.mxu0 %v886_v45 }
 0x400   : > { %2354 = vmatprep.subr.bf16.mxu0 %v2557_v3 }
 0x401   : > { %v991_v48 = vpop.permute.xlu0 %990 }
 0x406   : > { %2345 = vmatmul.mubr.msk.bf16.vlgmr.msra.gmra.mrb[4].mxu0 %vm881_vm5, %v871_v42 }
 0x407   : > { %2355 = vmatpush3.bf16.xpose.msra.mxu0 %v998_v47  ;;  %2356 = vmatprep.mubr.msk.bf16.mxu0 %vm2559_vm0, %v2557_v3 }
 0x408   : > { %2366 = vmatprep.subr.bf16.mxu0 %v2557_v3 }
 0x40e   : > { %2357 = vmatmul.mubr.msk.bf16.vlgmr.msra.gmra.mrb[8].mxu0 %vm881_vm5, %v991_v48 }
 0x40f   : > { %2370 = vmatprep.mubr.msk.bf16.mxu0 %vm2559_vm0, %v2557_v3  ;;  %2367 = vmatpush3.bf16.msra.mxu0 %v2494_v26 }
 0x410   : > { %2368 = vmatprep.subr.bf16.mxu0 %v2557_v3 }
 0x413   : > { %2369 = vmatpush3.bf16.msra.mxu0 %v2495_v27 }
 0x414   : > { %2382 = vmatprep.subr.bf16.mxu0 %v2557_v3 }
 0x4d9   : > { %v922_v55 = vpop.f32.mrb[4].mxu0 }
 0x4da   : > { %v923_v56 = vadd.f32 %v922_v55, %v2768_v54  ;;  %v2346_v57 = vpop.f32.mrb[5].mxu0 }
 0x4db   : > { %v925_v58 = vpop.f32.mrb[6].mxu0 }
 0x4dc   : > { %v2347_v59 = vpop.f32.mrb[7].mxu0  ;;  %v929_v60 = vsel %vm928_vm6, %v923_v56, -inf }
 0x4dd   : > { %930 = vmax.xlane.f32.xlu0 %v929_v60 }
 0x4e1   : > { %v1034_v61 = vpop.f32.mrb[8].mxu0 }
 0x4e2   : > { %v1035_v62 = vadd.f32 %v1034_v61, %v2768_v54  ;;  %v2358_v63 = vpop.f32.mrb[9].mxu0  ;;  %v2197_v61 = vld [vmem:[%s3017_s10] ss:$0 sm:$0xff] }
 0x4e3   : > { %v1037_v0 = vpop.f32.mrb[10].mxu0  ;;  %v2198_v63 = vld [vmem:[%s3018_s11] ss:$0 sm:$0xff] }
 0x4e4   : > { %v2359_v1 = vpop.f32.mrb[11].mxu0  ;;  %v1040_v2 = vsel %vm928_vm6, %v1035_v62, -inf }
 0x4e5   : > { %1041 = vmax.xlane.f32.xlu1 %v1040_v2 }
 0x4f6   : > { %1052 = vrot.lane.b32.xlu1 %v871_v42, %s3034_s27 }
 0x56a   : > { %v931_v4 = vpop.xlane.xlu0 %930 }
 0x56b   : > { %v932_v5 = vsub.f32 %v923_v56, %v931_v4  ;;  %v2496_v56 = vld [vmem:[%s3019_s12] sm:$0xff]  }
 0x56c   : > { %v2498_v4 = vld [vmem:[%s3021_s14] sm:$0xff]  }
 0x56d   : > { %v933_v6 = vmul.f32 1.442695, %v932_v5  ;;  %v2499_v5 = vld [vmem:[%s3021_s14 + $0x8] sm:$0xff]  }
 0x56f   : > { %2518 = vpow2.f32 %v933_v6  ;;  %v2500_v6 = vld [vmem:[%s3021_s14 + $0x10] sm:$0xff]  }
 0x572   : > { %v1042_v7 = vpop.xlane.xlu1 %1041 }
 0x573   : > { %v1043_v8 = vsub.f32 %v1035_v62, %v1042_v7  ;;  %v2501_v7 = vld [vmem:[%s3021_s14 + $0x18] sm:$0xff]  }
 0x575   : > { %v1044_v9 = vmul.f32 1.442695, %v1043_v8  ;;  %v2199_v8 = vld [vmem:[%s3020_s13] ss:$0 sm:$0xff] }
 0x576   : > { %v1053_v20 = vpop.permute.xlu1 %1052 }
 0x577   : > { %2520 = vpow2.f32 %v1044_v9  ;;  %v1058_v22 = vsel %vm946_vm7, %v1053_v20, 0 }
 0x579   : > { %v2519_v10 = vpop.eup %2518 }
 0x57a   : > { %v935_v11 = vsel %vm928_vm6, %v2519_v10, 0.0 }
 0x57b   : > { %936 = vadd.xlane.f32.xlu0 %v935_v11 }
 0x581   : > { %v2521_v12 = vpop.eup %2520 }
 0x582   : > { %v1046_v13 = vsel %vm928_vm6, %v2521_v12, 0.0 }
 0x583   : > { %1047 = vadd.xlane.f32.xlu0 %v1046_v13 }
 0x599   : > { %941 = vrot.lane.b32.xlu0 %v871_v42, %s2564_s30 }
 0x608   : > { %v937_v14 = vpop.xlane.xlu0 %936 }
 0x609   : > { %2522 = vrcp.f32 %v937_v14 }
 0x610   : > { %v1048_v15 = vpop.xlane.xlu0 %1047 }
 0x611   : > { %2524 = vrcp.f32 %v1048_v15 }
 0x613   : > { %v2523_v16 = vpop.eup %2522 }
 0x614   : > { %v939_v17 = vmul.f32 %v2523_v16, %v2519_v10  ;;  %v942_v18 = vpop.permute.xlu0 %941 }
 0x615   : > { %v948_v19 = vsel %vm946_vm7, %v942_v18, 0 }
 0x616   : > { %2349 = vmatpush3.bf16.msra.mxu1 %v948_v19  ;;  %v940_v21 = vpack.c.bf16 %v939_v17, %v939_v17 }
 0x617   : > { %2360 = vmatprep.subr.bf16.mxu1 %v2557_v3 }
 0x619   : > { %2351 = vmatmul.mubr.msk.bf16.vlgmr.msra.gmra.mrb[4].mxu1 %vm928_vm6, %v940_v21 }
 0x61a   : > { %2361 = vmatpush3.bf16.msra.mxu1 %v1058_v22  ;;  %2362 = vmatprep.mubr.msk.bf16.mxu1 %vm2559_vm0, %v2557_v3 }
 0x61b   : > { %v2525_v23 = vpop.eup %2524  ;;  %2374 = vmatprep.subr.bf16.mxu1 %v2557_v3 }
 0x61c   : > { %v1050_v24 = vmul.f32 %v2525_v23, %v2521_v12 }
 0x61e   : > { %v1051_v25 = vpack.c.bf16 %v1050_v24, %v1050_v24  ;;  %v2203_v24 = vld [vmem:[%s3022_s15] ss:$0 sm:$0xff] }
 0x621   : > { %2363 = vmatmul.mubr.msk.bf16.vlgmr.msra.gmra.mrb[8].mxu1 %vm928_vm6, %v1051_v25 }
 0x622   : > { %2378 = vmatprep.mubr.msk.bf16.mxu1 %vm2559_vm0, %v2557_v3  ;;  %2375 = vmatpush3.bf16.msra.mxu1 %v2496_v56 }
 0x623   : > { %2376 = vmatprep.subr.bf16.mxu1 %v2557_v3 }
 0x6ec   : > { %v984_v28 = vpop.f32.mrb[4].mxu1 }
 0x6ed   : > { %v2352_v29 = vpop.f32.mrb[5].mxu1 }
 0x6ee   : > { %v987_v30 = vpop.f32.mrb[6].mxu1 }
 0x6ef   : > { %v2353_v31 = vpop.f32.mrb[7].mxu1 }
 0x6f4   : > { %v1094_v32 = vpop.f32.mrb[8].mxu1 }
 0x6f5   : > { %1101 = vrot.lane.b32.xlu1 %v1094_v32, %s3033_s2  ;;  %v2364_v33 = vpop.f32.mrb[9].mxu1 }
 0x6f6   : > { %v1097_v34 = vpop.f32.mrb[10].mxu1 }
 0x6f7   : > { %v2365_v36 = vpop.f32.mrb[11].mxu1 }
 0x767   : > { %v1102_v37 = vpop.permute.xlu1 %1101 }
 0x768   : > { %v1104_v38 = vsel %vm881_vm5, %v984_v28, %v1102_v37 }
 0x769   : > { %v1105_v39 = vpack.c.bf16 %v1104_v38, %v1104_v38  ;;  %v2502_v38 = vld [vmem:[%s3045_s0 + $0x10] sm:$0xff]  }
 0x76b   : > { %2371 = vmatmul.mubr.msk.bf16.vlgmr.msra.gmra.mrb[12].mxu0 %vm728_vm4, %v1105_v39  ;;  %v2503_v39 = vld [vmem:[%s3045_s0 + $0x18] sm:$0xff]  }
 0x76c   : > { %2390 = vmatprep.mubr.msk.bf16.mxu0 %vm2559_vm0, %v2557_v3  ;;  %2383 = vmatpush3.bf16.msra.mxu0 %v2498_v4 }
 0x76d   : > { %2384 = vmatprep.subr.bf16.mxu0 %v2557_v3 }
 0x770   : > { %2385 = vmatpush3.bf16.msra.mxu0 %v2499_v5 }
 0x771   : > { %2386 = vmatprep.subr.bf16.mxu0 %v2557_v3 }
 0x774   : > { %2387 = vmatpush3.bf16.msra.mxu0 %v2500_v6 }
 0x775   : > { %2388 = vmatprep.subr.bf16.mxu0 %v2557_v3 }
 0x778   : > { %2389 = vmatpush3.bf16.msra.mxu0 %v2501_v7 }
 0x779   : > { %2408 = vmatprep.subr.bf16.mxu0 %v2557_v3 }
 0x83e   : > { %v1166_v41 = vpop.f32.mrb[12].mxu0 }
 0x83f   : > { %v1167_v42 = vadd.f32 %v2193_v40, %v1166_v41  ;;  %v2372_v43 = vpop.f32.mrb[13].mxu0 }
 0x840   : > { %v1169_v44 = vpop.f32.mrb[14].mxu0 }
 0x841   : > { %v2373_v45 = vpop.f32.mrb[15].mxu0  ;;  %v1172_v46 = vadd.f32 %v1167_v42, %v2735_v35  ;;  %v2497_v35 = vld [vmem:[%s3019_s12 + $0x8] sm:$0xff]   ;;  %v2209_v44 = vld [vmem:[%s3023_s16] ss:$0 sm:$0xff] }
 0x842   : > { %2377 = vmatpush3.bf16.msra.mxu1 %v2497_v35 }
 0x843   : > { %v1175_v47 = vsel %vm728_vm4, %v1172_v46, 0.0  ;;  %2394 = vmatprep.subr.bf16.mxu1 %v2557_v3 }
 0x844   : > { %1176 = vadd.xlane.f32.xlu0 %v1175_v47 }
 0x8d1   : > { %v1177_v48 = vpop.xlane.xlu0 %1176 }
 0x8d2   : > { %v1178_v49 = vmul.f32 0.03125, %v1177_v48 }
 0x8d4   : > { %v1179_v50 = vsub.f32 %v1172_v46, %v1178_v49  ;;  %v2210_v46 = vld [vmem:[%s3024_s17] ss:$0 sm:$0xff] }
 0x8d6   : > { %v1180_v52 = vmul.f32 %v1179_v50, %v1179_v50 }
 0x8d8   : > { %v1181_v55 = vsel %vm728_vm4, %v1180_v52, 0.0 }
 0x8d9   : > { %1182 = vadd.xlane.f32.xlu1 %v1181_v55 }
 0x966   : > { %v1183_v57 = vpop.xlane.xlu1 %1182 }
 0x967   : > { %v1184_v58 = vmul.f32 0.03125, %v1183_v57 }
 0x969   : > { %v1185_v59 = vadd.f32 1e-12, %v1184_v58 }
 0x96b   : > { %2526 = vrsqrt.f32 %v1185_v59 }
 0x975   : > { %v2527_v60 = vpop.eup %2526 }
 0x976   : > { %v1187_v62 = vmul.f32 %v2527_v60, %v1179_v50  ;;  %v2216_v50 = vld [vmem:[%s3014_s7 + $0x1] ss:$0 sm:$0xff] }
 0x978   : > { %v1194_v0 = vmul.f32 %v2197_v61, %v1187_v62 }
 0x97a   : > { %v1201_v1 = vadd.f32 %v2198_v63, %v1194_v0 }
 0x97c   : > { %v1202_v2 = vpack.c.bf16 %v1201_v1, %v1201_v1 }
 0x97e   : > { %2379 = vmatmul.mubr.msk.bf16.vlgmr.msra.gmra.mrb[12].mxu1 %vm728_vm4, %v1202_v2 }
 0x97f   : > { %2398 = vmatprep.mubr.msk.bf16.mxu1 %vm2559_vm0, %v2557_v3  ;;  %2395 = vmatpush3.bf16.msra.mxu1 %v2502_v38 }
 0x980   : > { %2396 = vmatprep.subr.bf16.mxu1 %v2557_v3 }
 0x983   : > { %2397 = vmatpush3.bf16.msra.mxu1 %v2503_v39 }
 0x984   : > { %2402 = vmatprep.subr.bf16.mxu1 %v2557_v3 }
 0xa51   : > { %v1263_v9 = vpop.f32.mrb[12].mxu1 }
 0xa52   : > { %v1264_v10 = vadd.f32 %v2199_v8, %v1263_v9  ;;  %v2380_v11 = vpop.f32.mrb[13].mxu1 }
 0xa53   : > { %v1266_v12 = vpop.f32.mrb[14].mxu1 }
 0xa54   : > { %v1269_v13 = vmul.f32 %v1264_v10, %v1264_v10  ;;  %v2381_v14 = vpop.f32.mrb[15].mxu1 }
 0xa56   : > { %v1270_v15 = vmul.f32 %v1269_v13, %v1264_v10 }
 0xa58   : > { %v1271_v16 = vmul.f32 0.044715, %v1270_v15 }
 0xa5a   : > { %v1272_v17 = vadd.f32 %v1271_v16, %v1264_v10 }
 0xa5c   : > { %v1273_v18 = vmul.f32 0.7978846, %v1272_v17 }
 0xa5e   : > { %2528 = vtanh.f32 %v1273_v18 }
 0xa68   : > { %v2529_v19 = vpop.eup %2528 }
 0xa69   : > { %v1275_v20 = vadd.f32 1.0, %v2529_v19 }
 0xa6b   : > { %v1276_v21 = vmul.f32 0.5, %v1275_v20 }
 0xa6d   : > { %v1277_v22 = vmul.f32 %v1276_v21, %v1264_v10 }
 0xa6f   : > { %v1278_v23 = vpack.c.bf16 %v1277_v22, %v1277_v22 }
 0xa71   : > { %2391 = vmatmul.mubr.msk.bf16.vlgmr.msra.gmra.mrb[16].mxu0 %vm1318_vm8, %v1278_v23 }
 0xa72   : > { %2410 = vmatprep.mubr.msk.bf16.mxu0 %vm2559_vm0, %v2557_v3 }
 0xb44   : > { %v1356_v25 = vpop.f32.mrb[16].mxu0 }
 0xb45   : > { %v1357_v26 = vadd.f32 %v2203_v24, %v1356_v25  ;;  %v2392_v27 = vpop.f32.mrb[17].mxu0 }
 0xb46   : > { %v1359_v28 = vpop.f32.mrb[18].mxu0 }
 0xb47   : > { %v2393_v29 = vpop.f32.mrb[19].mxu0  ;;  %v1362_v30 = vadd.f32 %v1357_v26, %v1201_v1 }
 0xb49   : > { %v1365_v31 = vsel %vm728_vm4, %v1362_v30, 0.0 }
 0xb4a   : > { %1366 = vadd.xlane.f32.xlu0 %v1365_v31 }
 0xbd7   : > { %v1367_v32 = vpop.xlane.xlu0 %1366 }
 0xbd8   : > { %v1368_v33 = vmul.f32 0.03125, %v1367_v32 }
 0xbda   : > { %v1369_v34 = vsub.f32 %v1362_v30, %v1368_v33 }
 0xbdc   : > { %v1370_v36 = vmul.f32 %v1369_v34, %v1369_v34 }
 0xbde   : > { %v1371_v37 = vsel %vm728_vm4, %v1370_v36, 0.0  ;;  %v2505_v36 = vld [vmem:[%s3015_s8 + $0x18] sm:$0xff]  }
 0xbdf   : > { %1372 = vadd.xlane.f32.xlu0 %v1371_v37 }
 0xc6c   : > { %v1373_v40 = vpop.xlane.xlu0 %1372 }
 0xc6d   : > { %v1374_v41 = vmul.f32 0.03125, %v1373_v40 }
 0xc6f   : > { %v1375_v42 = vadd.f32 1e-12, %v1374_v41 }
 0xc71   : > { %2530 = vrsqrt.f32 %v1375_v42 }
 0xc7b   : > { %v2531_v43 = vpop.eup %2530 }
 0xc7c   : > { %v1377_v45 = vmul.f32 %v2531_v43, %v1369_v34  ;;  %v2504_v34 = vld [vmem:[%s3015_s8 + $0x10] sm:$0xff]  }
 0xc7e   : > { %v1384_v47 = vmul.f32 %v2209_v44, %v1377_v45 }
 0xc80   : > { %v2865_v48 = vadd.f32 %v2210_v46, %v1384_v47 }
 0xc82   : > { %v1392_v49 = vpack.c.bf16 %v2865_v48, %v2865_v48 }
 0xc84   : > { %2399 = vmatmul.mubr.msk.bf16.vlgmr.msra.gmra.mrb[16].mxu1 %vm728_vm4, %v1392_v49  ;;  %v2229_v49 = vld [vmem:[%s3016_s9 + $0x1] ss:$0 sm:$0xff] }
 0xc85   : > { %2404 = vmatprep.mubr.msk.bf16.mxu1 %vm2559_vm0, %v2557_v3 }
 0xd57   : > { %v1455_v52 = vpop.f32.mrb[16].mxu1 }
 0xd58   : > { %v1456_v55 = vadd.f32 %v2216_v50, %v1455_v52  ;;  %v2400_v56 = vpop.f32.mrb[17].mxu1 }
 0xd59   : > { %v1458_v35 = vpop.f32.mrb[18].mxu1 }
 0xd5a   : > { %v1461_v57 = vpack.c.bf16 %v1456_v55, %v1456_v55  ;;  %v2401_v58 = vpop.f32.mrb[19].mxu1 }
 0xd5c   : > { %1573 = vrot.lane.b32.xlu0 %v1461_v57, %s2560_s23  ;;  %1463 = vrot.lane.b32.xlu1 %v1461_v57, %s2561_s1  ;;  %s3049_s23 = smov 48  }
 0xd60   : > { %1571 = vrot.lane.b32.xlu1 %v1461_v57, %s2562_s5 }
 0xdce   : > { %v1464_v59 = vpop.permute.xlu1 %1463  ;;  %v1574_v61 = vpop.permute.xlu0 %1573 }
 0xdcf   : > { %v1469_v60 = vsel %vm881_vm5, %v1464_v59, 0  ;;  %v1579_v62 = vsel %vm881_vm5, %v1574_v61, 0 }
 0xdd0   : > { %2403 = vmatpush3.bf16.xpose.msra.mxu1 %v1469_v60 }
 0xdd1   : > { %2414 = vmatprep.subr.bf16.mxu1 %v2557_v3 }
 0xdd2   : > { %v1572_v63 = vpop.permute.xlu1 %1571 }
 0xdd7   : > { %2405 = vmatmul.mubr.msk.bf16.vlgmr.msra.gmra.mrb[20].mxu1 %vm881_vm5, %v1461_v57 }
 0xdd8   : > { %2415 = vmatpush3.bf16.xpose.msra.mxu1 %v1579_v62  ;;  %2416 = vmatprep.mubr.msk.bf16.mxu1 %vm2559_vm0, %v2557_v3 }
 0xdd9   : > { %2426 = vmatprep.subr.bf16.mxu1 %v2557_v3 }
 0xddf   : > { %2417 = vmatmul.mubr.msk.bf16.vlgmr.msra.gmra.mrb[24].mxu1 %vm881_vm5, %v1572_v63 }
 0xde0   : > { %2430 = vmatprep.mubr.msk.bf16.mxu1 %vm2559_vm0, %v2557_v3  ;;  %2427 = vmatpush3.bf16.msra.mxu1 %v2504_v34 }
 0xde1   : > { %2428 = vmatprep.subr.bf16.mxu1 %v2557_v3 }
 0xde4   : > { %2429 = vmatpush3.bf16.msra.mxu1 %v2505_v36 }
 0xde5   : > { %2442 = vmatprep.subr.bf16.mxu1 %v2557_v3 }
 0xeaa   : > { %v1505_v0 = vpop.f32.mrb[20].mxu1 }
 0xeab   : > { %v1506_v1 = vadd.f32 %v1505_v0, %v2768_v54  ;;  %v2406_v2 = vpop.f32.mrb[21].mxu1  ;;  %v2506_v0 = vld [vmem:[%s3019_s12 + $0x10] sm:$0xff]  }
 0xeac   : > { %v1508_v4 = vpop.f32.mrb[22].mxu1 }
 0xead   : > { %v2407_v5 = vpop.f32.mrb[23].mxu1  ;;  %v1511_v6 = vsel %vm928_vm6, %v1506_v1, -inf }
 0xeae   : > { %1512 = vmax.xlane.f32.xlu1 %v1511_v6  ;;  %v2235_v6 = vld [vmem:[%s3017_s10 + $0x1] ss:$0 sm:$0xff] }
 0xeb2   : > { %v1615_v7 = vpop.f32.mrb[24].mxu1 }
 0xeb3   : > { %v1616_v8 = vadd.f32 %v1615_v7, %v2768_v54  ;;  %v2418_v9 = vpop.f32.mrb[25].mxu1 }
 0xeb4   : > { %v1618_v10 = vpop.f32.mrb[26].mxu1 }
 0xeb5   : > { %v2419_v11 = vpop.f32.mrb[27].mxu1  ;;  %v1621_v12 = vsel %vm928_vm6, %v1616_v8, -inf }
 0xeb6   : > { %1622 = vmax.xlane.f32.xlu0 %v1621_v12  ;;  %v2508_v12 = vld [vmem:[%s3021_s14 + $0x20] sm:$0xff]  }
 0xf3b   : > { %v1513_v13 = vpop.xlane.xlu1 %1512 }
 0xf3c   : > { %v1514_v14 = vsub.f32 %v1506_v1, %v1513_v13  ;;  %v2507_v1 = vld [vmem:[%s3019_s12 + $0x18] sm:$0xff]   ;;  %v2509_v13 = vld [vmem:[%s3021_s14 + $0x28] sm:$0xff]  }
 0xf3e   : > { %v1515_v15 = vmul.f32 1.442695, %v1514_v14  ;;  %v2510_v14 = vld [vmem:[%s3021_s14 + $0x30] sm:$0xff]  }
 0xf40   : > { %2532 = vpow2.f32 %v1515_v15  ;;  %v2511_v15 = vld [vmem:[%s3021_s14 + $0x38] sm:$0xff]  }
 0xf43   : > { %v1623_v16 = vpop.xlane.xlu0 %1622 }
 0xf44   : > { %v1624_v17 = vsub.f32 %v1616_v8, %v1623_v16  ;;  %v2236_v8 = vld [vmem:[%s3018_s11 + $0x1] ss:$0 sm:$0xff] }
 0xf45   : > { %v2242_v16 = vld [vmem:[%s3020_s13 + $0x1] ss:$0 sm:$0xff] }
 0xf46   : > { %v1625_v18 = vmul.f32 1.442695, %v1624_v17 }
 0xf48   : > { %2534 = vpow2.f32 %v1625_v18 }
 0xf4a   : > { %v2533_v19 = vpop.eup %2532 }
 0xf4b   : > { %v1517_v20 = vsel %vm928_vm6, %v2533_v19, 0.0 }
 0xf4c   : > { %1518 = vadd.xlane.f32.xlu0 %v1517_v20 }
 0xf52   : > { %v2535_v21 = vpop.eup %2534 }
 0xf53   : > { %v1627_v54 = vsel %vm928_vm6, %v2535_v21, 0.0 }
 0xf54   : > { %1628 = vadd.xlane.f32.xlu1 %v1627_v54 }
 0xf62   : > { %1523 = vrot.lane.b32.xlu0 %v1461_v57, %s2564_s30 }
 0xf65   : > { %1633 = vrot.lane.b32.xlu1 %v1461_v57, %s3049_s23  ;;  %s3051_s23 = sshll.u32 %s3053_s28, 3 }
 0xf66   : > { %s692_s30 = scalar_lea.vmem %s3029_s22, %s3051_s23 }
 0xfd9   : > { %v1519_v22 = vpop.xlane.xlu0 %1518 }
 0xfda   : > { %2536 = vrcp.f32 %v1519_v22 }
 0xfdd   : > { %v1524_v23 = vpop.permute.xlu0 %1523 }
 0xfde   : > { %v1529_v24 = vsel %vm946_vm7, %v1524_v23, 0 }
 0xfdf   : > { %2409 = vmatpush3.bf16.msra.mxu0 %v1529_v24 }
 0xfe0   : > { %2420 = vmatprep.subr.bf16.mxu0 %v2557_v3 }
 0xfe1   : > { %v1629_v25 = vpop.xlane.xlu1 %1628 }
 0xfe2   : > { %2538 = vrcp.f32 %v1629_v25 }
 0xfe4   : > { %v2537_v26 = vpop.eup %2536 }
 0xfe5   : > { %v1521_v27 = vmul.f32 %v2537_v26, %v2533_v19  ;;  %v1634_v28 = vpop.permute.xlu1 %1633 }
 0xfe6   : > { %v1639_v30 = vsel %vm946_vm7, %v1634_v28, 0 }
 0xfe7   : > { %v1522_v29 = vpack.c.bf16 %v1521_v27, %v1521_v27 }
 0xfe9   : > { %2411 = vmatmul.mubr.msk.bf16.vlgmr.msra.gmra.mrb[20].mxu0 %vm928_vm6, %v1522_v29 }
 0xfea   : > { %2421 = vmatpush3.bf16.msra.mxu0 %v1639_v30  ;;  %2422 = vmatprep.mubr.msk.bf16.mxu0 %vm2559_vm0, %v2557_v3 }
 0xfeb   : > { %2434 = vmatprep.subr.bf16.mxu0 %v2557_v3 }
 0xfec   : > { %v2539_v31 = vpop.eup %2538 }
 0xfed   : > { %v1631_v32 = vmul.f32 %v2539_v31, %v2535_v21  ;;  %v2255_v31 = vld [vmem:[%s3022_s15 + $0x1] ss:$0 sm:$0xff] }
 0xfef   : > { %v1632_v33 = vpack.c.bf16 %v1631_v32, %v1631_v32 }
 0xff1   : > { %2423 = vmatmul.mubr.msk.bf16.vlgmr.msra.gmra.mrb[24].mxu0 %vm928_vm6, %v1632_v33 }
 0xff2   : > { %2438 = vmatprep.mubr.msk.bf16.mxu0 %vm2559_vm0, %v2557_v3  ;;  %2435 = vmatpush3.bf16.msra.mxu0 %v2506_v0 }
 0xff3   : > { %2436 = vmatprep.subr.bf16.mxu0 %v2557_v3 }
 0xff6   : > { %2437 = vmatpush3.bf16.msra.mxu0 %v2507_v1 }
 0xff7   : > { %2454 = vmatprep.subr.bf16.mxu0 %v2557_v3 }
0x10bc   : > { %v1565_v37 = vpop.f32.mrb[20].mxu0 }
0x10bd   : > { %v2412_v38 = vpop.f32.mrb[21].mxu0 }
0x10be   : > { %v1568_v39 = vpop.f32.mrb[22].mxu0 }
0x10bf   : > { %v2413_v40 = vpop.f32.mrb[23].mxu0 }
0x10c4   : > { %v1675_v41 = vpop.f32.mrb[24].mxu0 }
0x10c5   : > { %1682 = vrot.lane.b32.xlu1 %v1675_v41, %s3050_s29  ;;  %v2424_v42 = vpop.f32.mrb[25].mxu0 }
0x10c6   : > { %v1678_v43 = vpop.f32.mrb[26].mxu0 }
0x10c7   : > { %v2425_v44 = vpop.f32.mrb[27].mxu0 }
0x1137   : > { %v1683_v45 = vpop.permute.xlu1 %1682 }
0x1138   : > { %v1685_v46 = vsel %vm881_vm5, %v1565_v37, %v1683_v45  ;;  %v2512_v45 = vld [vmem:[%s3025_s18] sm:$0xff]  }
0x1139   : > { %v1686_v47 = vpack.c.bf16 %v1685_v46, %v1685_v46  ;;  %v2513_v46 = vld [vmem:[%s3025_s18 + $0x8] sm:$0xff]  }
0x113b   : > { %2431 = vmatmul.mubr.msk.bf16.vlgmr.msra.gmra.mrb[28].mxu1 %vm728_vm4, %v1686_v47 }
0x113c   : > { %2450 = vmatprep.mubr.msk.bf16.mxu1 %vm2559_vm0, %v2557_v3  ;;  %2443 = vmatpush3.bf16.msra.mxu1 %v2508_v12 }
0x113d   : > { %2444 = vmatprep.subr.bf16.mxu1 %v2557_v3 }
0x1140   : > { %2445 = vmatpush3.bf16.msra.mxu1 %v2509_v13 }
0x1141   : > { %2446 = vmatprep.subr.bf16.mxu1 %v2557_v3 }
0x1144   : > { %2447 = vmatpush3.bf16.msra.mxu1 %v2510_v14 }
0x1145   : > { %2448 = vmatprep.subr.bf16.mxu1 %v2557_v3 }
0x1148   : > { %2449 = vmatpush3.bf16.msra.mxu1 %v2511_v15 }
0x120e   : > { %v1749_v50 = vpop.f32.mrb[28].mxu1 }
0x120f   : > { %v1750_v52 = vadd.f32 %v2229_v49, %v1749_v50  ;;  %v2432_v55 = vpop.f32.mrb[29].mxu1 }
0x1210   : > { %v1752_v56 = vpop.f32.mrb[30].mxu1  ;;  %v2263_v55 = vld [vmem:[%s3023_s16 + $0x1] ss:$0 sm:$0xff] }
0x1211   : > { %v2433_v35 = vpop.f32.mrb[31].mxu1  ;;  %v1755_v57 = vadd.f32 %v1750_v52, %v2865_v48 }
0x1212   : > { %v2264_v35 = vld [vmem:[%s3024_s17 + $0x1] ss:$0 sm:$0xff] }
0x1213   : > { %v1760_v58 = vsel %vm728_vm4, %v1755_v57, 0.0 }
0x1214   : > { %1761 = vadd.xlane.f32.xlu0 %v1760_v58 }
0x12a1   : > { %v1762_v59 = vpop.xlane.xlu0 %1761 }
0x12a2   : > { %v1763_v60 = vmul.f32 0.03125, %v1762_v59 }
0x12a4   : > { %v1764_v61 = vsub.f32 %v1755_v57, %v1763_v60  ;;  %v2514_v60 = vld [vmem:[%s3027_s20] sm:$0xff]  }
0x12a6   : > { %v1765_v62 = vmul.f32 %v1764_v61, %v1764_v61 }
0x12a8   : > { %v1766_v63 = vsel %vm728_vm4, %v1765_v62, 0.0  ;;  %v1987_v62 = vld [vmem:[%s3026_s19] sm:$0x1] }
0x12a9   : > { %1767 = vadd.xlane.f32.xlu1 %v1766_v63 }
0x1336   : > { %v1768_v48 = vpop.xlane.xlu1 %1767 }
0x1337   : > { %v1769_v2 = vmul.f32 0.03125, %v1768_v48 }
0x1339   : > { %v1770_v4 = vadd.f32 1e-12, %v1769_v2 }
0x133b   : > { %2540 = vrsqrt.f32 %v1770_v4 }
0x1345   : > { %v2541_v5 = vpop.eup %2540 }
0x1346   : > { %v1772_v7 = vmul.f32 %v2541_v5, %v1764_v61  ;;  %v2515_v61 = vld [vmem:[%s3027_s20 + $0x8] sm:$0xff]  }
0x1348   : > { %v1779_v9 = vmul.f32 %v2235_v6, %v1772_v7 }
0x134a   : > { %v1786_v10 = vadd.f32 %v2236_v8, %v1779_v9 }
0x134c   : > { %v1787_v11 = vpack.c.bf16 %v1786_v10, %v1786_v10 }
0x134e   : > { %2439 = vmatmul.mubr.msk.bf16.vlgmr.msra.gmra.mrb[28].mxu0 %vm728_vm4, %v1787_v11 }
0x134f   : > { %2458 = vmatprep.mubr.msk.bf16.mxu0 %vm2559_vm0, %v2557_v3  ;;  %2455 = vmatpush3.bf16.msra.mxu0 %v2512_v45 }
0x1350   : > { %2456 = vmatprep.subr.bf16.mxu0 %v2557_v3 }
0x1353   : > { %2457 = vmatpush3.bf16.msra.mxu0 %v2513_v46 }
0x1354   : > { %2462 = vmatprep.subr.bf16.mxu0 %v2557_v3 }
0x1421   : > { %v1850_v17 = vpop.f32.mrb[28].mxu0 }
0x1422   : > { %v1851_v18 = vadd.f32 %v2242_v16, %v1850_v17  ;;  %v2440_v19 = vpop.f32.mrb[29].mxu0 }
0x1423   : > { %v1853_v20 = vpop.f32.mrb[30].mxu0 }
0x1424   : > { %v1856_v21 = vmul.f32 %v1851_v18, %v1851_v18  ;;  %v2441_v54 = vpop.f32.mrb[31].mxu0 }
0x1426   : > { %v1857_v22 = vmul.f32 %v1856_v21, %v1851_v18 }
0x1428   : > { %v1858_v23 = vmul.f32 0.044715, %v1857_v22 }
0x142a   : > { %v1859_v24 = vadd.f32 %v1858_v23, %v1851_v18 }
0x142c   : > { %v1860_v25 = vmul.f32 0.7978846, %v1859_v24 }
0x142e   : > { %2542 = vtanh.f32 %v1860_v25 }
0x1438   : > { %v2543_v26 = vpop.eup %2542 }
0x1439   : > { %v1862_v27 = vadd.f32 1.0, %v2543_v26 }
0x143b   : > { %v1863_v28 = vmul.f32 0.5, %v1862_v27 }
0x143d   : > { %v1864_v29 = vmul.f32 %v1863_v28, %v1851_v18 }
0x143f   : > { %v1865_v30 = vpack.c.bf16 %v1864_v29, %v1864_v29 }
0x1441   : > { %2451 = vmatmul.mubr.msk.bf16.vlgmr.msra.gmra.mrb[32].mxu1 %vm1318_vm8, %v1865_v30 }
0x1514   : > { %v1944_v32 = vpop.f32.mrb[32].mxu1 }
0x1515   : > { %v1945_v33 = vadd.f32 %v2255_v31, %v1944_v32  ;;  %v2452_v34 = vpop.f32.mrb[33].mxu1 }
0x1516   : > { %v1947_v36 = vpop.f32.mrb[34].mxu1 }
0x1517   : > { %v2453_v37 = vpop.f32.mrb[35].mxu1  ;;  %v1950_v38 = vadd.f32 %v1945_v33, %v1786_v10 }
0x1519   : > { %v1955_v39 = vsel %vm728_vm4, %v1950_v38, 0.0 }
0x151a   : > { %1956 = vadd.xlane.f32.xlu0 %v1955_v39 }
0x15a7   : > { %v1957_v40 = vpop.xlane.xlu0 %1956 }
0x15a8   : > { %v1958_v41 = vmul.f32 0.03125, %v1957_v40 }
0x15aa   : > { %v1959_v42 = vsub.f32 %v1950_v38, %v1958_v41 }
0x15ac   : > { %v1960_v43 = vmul.f32 %v1959_v42, %v1959_v42 }
0x15ae   : > { %v1961_v44 = vsel %vm728_vm4, %v1960_v43, 0.0 }
0x15af   : > { %1962 = vadd.xlane.f32.xlu0 %v1961_v44 }
0x163c   : > { %v1963_v47 = vpop.xlane.xlu0 %1962 }
0x163d   : > { %v1964_v49 = vmul.f32 0.03125, %v1963_v47 }
0x163f   : > { %v1965_v50 = vadd.f32 1e-12, %v1964_v49 }
0x1641   : > { %2544 = vrsqrt.f32 %v1965_v50 }
0x164b   : > { %v2545_v52 = vpop.eup %2544 }
0x164c   : > { %v1967_v56 = vmul.f32 %v2545_v52, %v1959_v42 }
0x164e   : > { %v1974_v57 = vmul.f32 %v2263_v55, %v1967_v56 }
0x1650   : > { %v1981_v58 = vadd.f32 %v2264_v35, %v1974_v57 }
0x1652   : > { %v1982_v59 = vpack.c.bf16 %v1981_v58, %v1981_v58 }
0x1654   : > { %2459 = vmatmul.mubr.msk.bf16.vlgmr.msra.gmra.mrb[32].mxu0 %vm728_vm4, %v1982_v59 }
0x1655   : > { %2466 = vmatprep.mubr.msk.bf16.mxu0 %vm2559_vm0, %v2557_v3  ;;  %2463 = vmatpush3.bf16.msra.mxu0 %v2514_v60 }
0x1656   : > { %2464 = vmatprep.subr.bf16.mxu0 %v2557_v3  ;;  %v2049_v3 = vld [vmem:[%s3028_s21] sm:$0x1] }
0x1659   : > { %2465 = vmatpush3.bf16.msra.mxu0 %v2515_v61 }
0x1727   : > { %v2037_v63 = vpop.f32.mrb[32].mxu0 }
0x1728   : > { %v2038_v0 = vadd.f32 %v2037_v63, %v1987_v62  ;;  %v2460_v1 = vpop.f32.mrb[33].mxu0 }
0x1729   : > { %v2040_v48 = vpop.f32.mrb[34].mxu0 }
0x172a   : > { %2546 = vtanh.f32 %v2038_v0  ;;  %v2461_v2 = vpop.f32.mrb[35].mxu0 }
0x1734   : > { %v2547_v4 = vpop.eup %2546 }
0x1735   : > { %v2044_v5 = vpack.c.bf16 %v2547_v4, %v2547_v4 }
0x1737   : > { %2467 = vmatmul.mubr.msk.bf16.vlgmr.msra.gmra.mrb[36].mxu0 %vm728_vm4, %v2044_v5 }
0x180a   : > { %v2099_v6 = vpop.f32.mrb[36].mxu0 }
0x180b   : > { %v2100_v7 = vadd.f32 %v2099_v6, %v2049_v3  ;;  %v2468_v8 = vpop.f32.mrb[37].mxu0 }
0x180c   : > { %v2102_v9 = vpop.f32.mrb[38].mxu0 }
0x180d   : > { %v2108_v10 = vrot.slane %v2100_v7, %v875_v53  ;;  %v2469_v11 = vpop.f32.mrb[39].mxu0 }
0x180f   : > { %2109 = vst [vmem:[%s692_s30] sm:$0xff] %v2108_v10 }
0x1810 PF: > { %s32_s3 = sadd.s32 1, %s2554_s3  }
0x1811   : > { %p29_p4 = scmp.ge.s32.totalorder %s32_s3, 4  }
0x1813   :  { %31 = sbr.rel (!%p29_p4) target bundleno = 8 (0x8), region = 153 }

</bundles_post_ra>
